<compile_context>
chip_gen: v5e
topology: v5e:2x2
jax: 0.10.0
libtpu: 0.0.40
codegen_flags: <defaults>
</compile_context>

<pallas_src>
import math

import jax
import jax.numpy as jnp
from jax.experimental import pallas as pl
from jax.experimental.pallas import tpu as pltpu


# ------------------------------ fused kernel ---------------------------------
def _make_fused_kernel(*, pooling, n_blocks, c_in0, c_outs, ks, pad,
                       w_in, h_c, w_c, pp_pad, big_guard, bsz, eps, act_dtype):
    """pool -> [conv (tap-accumulated matmuls) + FeatureNorm + ReLU] * n, fused."""
    hp, wp = h_c + 2 * pad, w_c + 2 * pad          # zero-padded spatial dims
    pp = hp * wp                                   # padded-flat pixel count (<= pp_pad)
    guard = pad * (wp + 1)                         # halo needed by the tap slices
    assert big_guard >= guard
    p_int = h_c * w_c                              # interior (real) pixels per image
    lanes = bsz * pp_pad                           # folded lane width per grid step
    inv_p = 1.0 / p_int
    inv_pm1 = 1.0 / max(p_int - 1, 1)
    # tap offsets in padded-flat coordinates; order matches the host-side weight
    # layout w.transpose(2, 3, 0, 1).reshape(ks*ks, c_out, c_in)
    offsets = [(dy - pad) * wp + (dx - pad) for dy in range(ks) for dx in range(ks)]

    def kernel(*refs):
        it = iter(refs)
        x_ref = next(it)
        imask_ref = next(it)
        sel_e_ref = next(it) if pooling else None
        sel_o_ref = next(it) if pooling else None
        blocks = [(next(it), next(it), next(it)) for _ in range(n_blocks)]
        out_ref = next(it)
        act_scr = next(it)        # (c_max, 2*big_guard + lanes), act_dtype

        interior = imask_ref[...] != 0.0           # (1, pp_pad) bool; halo+tail False

        # ---- clear the input channels, then place the (2x2 max-pooled) images ----
        act_scr[pl.ds(0, c_in0), :] = jnp.zeros((c_in0, act_scr.shape[1]), act_dtype)
        if pooling:
            sel_e = sel_e_ref[...]                 # (w_in, w_c) 0/1 decimation selectors
            sel_o = sel_o_ref[...]
        # TODO(synk): convert to lax.fori_loop row tiles for large h_c.
        for b in range(bsz):
            base = big_guard + b * pp_pad
            xb = x_ref[b]                          # (c_in0, H_in*W_in), act_dtype
            for r in range(h_c):
                if pooling:
                    row0 = xb[:, (2 * r) * w_in:(2 * r + 1) * w_in]
                    row1 = xb[:, (2 * r + 1) * w_in:(2 * r + 2) * w_in]
                    rmax = jnp.maximum(row0, row1)             # vertical pair max
                    prow = jnp.maximum(                        # horizontal pair max + decimate
                        jnp.dot(rmax, sel_e, preferred_element_type=jnp.float32),
                        jnp.dot(rmax, sel_o, preferred_element_type=jnp.float32))
                else:
                    prow = xb[:, r * w_in:(r + 1) * w_in]
                act_scr[pl.ds(0, c_in0),
                        pl.ds(base + (r + pad) * wp + pad, w_c)] = prow.astype(act_dtype)

        # ---- conv blocks: tap-accumulated MXU matmuls -> FeatureNorm -> ReLU ----
        c_in = c_in0
        for l in range(n_blocks):
            w_ref, sc_ref, bi_ref = blocks[l]
            c_out = c_outs[l]

            y = None                                            # (c_out, lanes) f32
            for t, s in enumerate(offsets):
                av = act_scr[pl.ds(0, c_in), pl.ds(big_guard + s, lanes)]
                part = jnp.dot(w_ref[t], av, preferred_element_type=jnp.float32)
                y = part if y is None else y + part

            scale = sc_ref[...]                                 # (c_out, 1) f32
            bias = bi_ref[...]
            for b in range(bsz):
                y_b = y[:, b * pp_pad:(b + 1) * pp_pad]         # aligned lane slice
                ym = jnp.where(interior, y_b, 0.0)              # NaN-safe halo mask
                s1 = jnp.sum(ym, axis=1, keepdims=True)
                s2 = jnp.sum(ym * ym, axis=1, keepdims=True)
                mean = s1 * inv_p
                # TODO(synk): switch to two-pass / shifted stats when row-tiling
                # large images (one-pass variance cancels in f32).
                var = jnp.maximum((s2 - s1 * mean) * inv_pm1, 0.0)
                inv = jax.lax.rsqrt(jnp.sqrt(var) + eps)        # 1/sqrt(std+eps) (EUP)
                a_b = jnp.maximum(scale * ((y_b - mean) * inv) + bias, 0.0)
                if l + 1 < n_blocks:
                    # keep halo/tail exactly zero for the next block's taps
                    act_scr[pl.ds(0, c_out), pl.ds(big_guard + b * pp_pad, pp_pad)] = \
                        jnp.where(interior, a_b, 0.0).astype(act_dtype)
                else:
                    out_ref[b] = a_b                            # lane-dense f32 store
            c_in = c_out

    return kernel


# ------------------------------- DownSampling --------------------------------
def downsampling_forward(x, params, pooling, padding, eps=0.001,
                         mxu_dtype=jnp.bfloat16):
    n, c_in0, h0, w0 = x.shape
    ks = int(params[0][0].shape[2])
    assert all(int(w.shape[2]) == ks and int(w.shape[3]) == ks for (w, _, _) in params)
    assert 2 * padding == ks - 1, "fused kernel assumes stride-1 'same' convolutions"
    if pooling:
        assert h0 % 2 == 0 and w0 % 2 == 0, "MaxPool2d(2) needs even spatial dims"
        h_c, w_c = h0 // 2, w0 // 2
    else:
        h_c, w_c = h0, w0

    hp, wp = h_c + 2 * padding, w_c + 2 * padding
    pp = hp * wp
    pp_pad = -(-pp // 128) * 128                       # lane-dense padded width
    guard = padding * (wp + 1)
    big_guard = 0 if guard == 0 else -(-guard // 128) * 128
    c_outs = tuple(int(w.shape[0]) for (w, _, _) in params)
    c_last = c_outs[-1]
    c_max = max((c_in0,) + c_outs)

    # fold as many images as possible into the lane axis (largest divisor of n)
    max_lanes = 2048
    bsz = 1
    for d in range(1, n + 1):
        if n % d == 0 and d * pp_pad <= max_lanes:
            bsz = d
    lanes = bsz * pp_pad
    grid = (n // bsz,)

    act_dtype = mxu_dtype

    # ---- kernel inputs (weights & small constants stay resident in VMEM) ----
    inputs = [x.reshape(n, c_in0, h0 * w0).astype(act_dtype)]   # halve input DMA (bf16)
    in_specs = [pl.BlockSpec((bsz, c_in0, h0 * w0), lambda i: (i, 0, 0))]

    hh = jnp.arange(hp)
    ww = jnp.arange(wp)
    interior = (((hh >= padding) & (hh < padding + h_c))[:, None]
                & ((ww >= padding) & (ww < padding + w_c))[None, :]).reshape(1, pp)
    imask = jnp.pad(interior.astype(jnp.float32), ((0, 0), (0, pp_pad - pp)))
    inputs.append(imask)
    in_specs.append(pl.BlockSpec((1, pp_pad), lambda i: (0, 0)))

    if pooling:
        cols = jnp.arange(w0)[:, None]
        sel_e = (cols == 2 * jnp.arange(w_c)[None, :]).astype(act_dtype)
        sel_o = (cols == 2 * jnp.arange(w_c)[None, :] + 1).astype(act_dtype)
        inputs += [sel_e, sel_o]
        in_specs += [pl.BlockSpec((w0, w_c), lambda i: (0, 0))] * 2

    c_in = c_in0
    for (w, scale, bias) in params:
        c_out = int(w.shape[0])
        # (ks*ks, c_out, c_in): tap-major so the kernel slices one tap per matmul
        wk = w.transpose(2, 3, 0, 1).reshape(ks * ks, c_out, c_in).astype(mxu_dtype)
        inputs += [wk,
                   scale.reshape(c_out, 1).astype(jnp.float32),
                   bias.reshape(c_out, 1).astype(jnp.float32)]
        in_specs += [pl.BlockSpec((ks * ks, c_out, c_in), lambda i: (0, 0, 0)),
                     pl.BlockSpec((c_out, 1), lambda i: (0, 0)),
                     pl.BlockSpec((c_out, 1), lambda i: (0, 0))]
        c_in = c_out

    kernel = _make_fused_kernel(
        pooling=pooling, n_blocks=len(params), c_in0=c_in0, c_outs=c_outs,
        ks=ks, pad=padding, w_in=w0, h_c=h_c, w_c=w_c, pp_pad=pp_pad,
        big_guard=big_guard, bsz=bsz, eps=eps, act_dtype=act_dtype)

    # explicit VMEM budget (scratch + double-buffered in/out blocks) + headroom
    itemsize = jnp.dtype(act_dtype).itemsize
    act_bytes = c_max * (2 * big_guard + lanes) * itemsize
    io_bytes = 2 * (bsz * c_in0 * h0 * w0 * itemsize + bsz * c_last * pp_pad * 4)
    vmem_limit = int(min(100 << 20, max(32 << 20, 2 * (act_bytes + io_bytes) + (8 << 20))))

    out_flat = pl.pallas_call(
        kernel,
        out_shape=jax.ShapeDtypeStruct((n, c_last, pp_pad), jnp.float32),
        grid_spec=pltpu.PrefetchScalarGridSpec(
            num_scalar_prefetch=0,
            grid=grid,
            in_specs=in_specs,
            out_specs=pl.BlockSpec((bsz, c_last, pp_pad), lambda i: (i, 0, 0)),
            scratch_shapes=[pltpu.VMEM((c_max, 2 * big_guard + lanes), act_dtype)],
        ),
        compiler_params=pltpu.CompilerParams(
            dimension_semantics=("parallel",),
            vmem_limit_bytes=vmem_limit),
    )(*inputs)

    # cheap glue at small sizes: drop lane padding + halo, recover NCHW
    out = out_flat[:, :, :pp].reshape(n, c_last, hp, wp)
    return out[:, :, padding:padding + h_c, padding:padding + w_c]


def init_params(key, n_conv_blocks, in_channels, out_channels, kernel_size):
    params = []
    c_in = in_channels
    for _ in range(n_conv_blocks):
        key, sub = jax.random.split(key)
        fan_in = c_in * kernel_size * kernel_size
        fan_out = out_channels * kernel_size * kernel_size
        std = math.sqrt(2.0 / (fan_in + fan_out))               # xavier_normal_
        w = std * jax.random.normal(
            sub, (out_channels, c_in, kernel_size, kernel_size), jnp.float32)
        scale = jnp.ones((1, out_channels, 1, 1), jnp.float32)  # FeatureNorm scale
        bias = jnp.zeros((1, out_channels, 1, 1), jnp.float32)  # FeatureNorm bias
        params.append((w, scale, bias))
        c_in = out_channels
    return params


# --------------------------- pure-JAX reference -------------------------------
def _reference(x, params, pooling, padding, eps=0.001):
    if pooling:
        n, c, h, w = x.shape
        x = x.reshape(n, c, h // 2, 2, w // 2, 2).max(axis=(3, 5))
    for (wgt, scale, bias) in params:
        y = jax.lax.conv_general_dilated(
            x, wgt, window_strides=(1, 1),
            padding=((padding, padding), (padding, padding)),
            dimension_numbers=("NCHW", "OIHW", "NCHW"),
            precision=jax.lax.Precision.HIGHEST)
        mean = jnp.mean(y, axis=(2, 3), keepdims=True)
        std = jnp.std(y, axis=(2, 3), keepdims=True, ddof=1)
        y = scale * ((y - mean) / jnp.sqrt(std + eps)) + bias
        x = jnp.maximum(y, 0.0)
    return x


if __name__ == "__main__":
    pooling = True
    n_conv_blocks = 2
    in_channels, out_channels = 4, 8
    kernel_size, padding = 3, 1

    key = jax.random.PRNGKey(0)
    key, kx = jax.random.split(key)
    x = jax.random.normal(kx, (2, 4, 16, 16), jnp.float32)
    params = init_params(key, n_conv_blocks, in_channels, out_channels, kernel_size)

    ref = jax.block_until_ready(_reference(x, params, pooling, padding))

    # exact-semantics check with f32 MXU inputs
    out_f32 = jax.block_until_ready(
        downsampling_forward(x, params, pooling, padding, mxu_dtype=jnp.float32))
    assert out_f32.shape == ref.shape == (2, 8, 8, 8), out_f32.shape
    assert jnp.allclose(out_f32, ref, rtol=1e-3, atol=1e-3), \
        float(jnp.max(jnp.abs(out_f32 - ref)))

    # default fast path: bf16 MXU inputs / activations, f32 accum + f32 FeatureNorm
    # (documented opt-in numerics change vs. the f32 PyTorch reference)
    out_bf16 = jax.block_until_ready(downsampling_forward(x, params, pooling, padding))
    assert out_bf16.shape == ref.shape
    assert jnp.allclose(out_bf16, ref, rtol=1e-1, atol=1e-1), \
        float(jnp.max(jnp.abs(out_bf16 - ref)))

    print("KERNEL_OK")
</pallas_src>

<mosaic_0001>
module attributes {stable_mosaic.version = 11 : i64} {
  func.func @kernel(%arg0: i32, %arg1: memref<2x4x256xf32, #tpu.memory_space<vmem>>, %arg2: memref<1x128xf32, #tpu.memory_space<vmem>>, %arg3: memref<16x8xf32, #tpu.memory_space<vmem>>, %arg4: memref<16x8xf32, #tpu.memory_space<vmem>>, %arg5: memref<9x8x4xf32, #tpu.memory_space<vmem>>, %arg6: memref<8x1xf32, #tpu.memory_space<vmem>>, %arg7: memref<8x1xf32, #tpu.memory_space<vmem>>, %arg8: memref<9x8x8xf32, #tpu.memory_space<vmem>>, %arg9: memref<8x1xf32, #tpu.memory_space<vmem>>, %arg10: memref<8x1xf32, #tpu.memory_space<vmem>>, %arg11: memref<2x8x128xf32, #tpu.memory_space<vmem>>, %arg12: memref<8x512xf32, #tpu.memory_space<vmem>>) attributes {dimension_semantics = [#tpu.dimension_semantics<parallel>], iteration_bounds = array<i64: 1>, scalar_prefetch = 0 : i64, scratch_operands = 1 : i64, tpu.core_type = #tpu.core_type<tc>, window_params = [{transform_indices = @transform_0, window_bounds = array<i64: 2, 4, 256>}, {pipeline_mode = #tpu.pipeline_mode<synchronous>, transform_indices = @transform_1, window_bounds = array<i64: 1, 128>}, {pipeline_mode = #tpu.pipeline_mode<synchronous>, transform_indices = @transform_2, window_bounds = array<i64: 16, 8>}, {pipeline_mode = #tpu.pipeline_mode<synchronous>, transform_indices = @transform_3, window_bounds = array<i64: 16, 8>}, {pipeline_mode = #tpu.pipeline_mode<synchronous>, transform_indices = @transform_4, window_bounds = array<i64: 9, 8, 4>}, {pipeline_mode = #tpu.pipeline_mode<synchronous>, transform_indices = @transform_5, window_bounds = array<i64: 8, 1>}, {pipeline_mode = #tpu.pipeline_mode<synchronous>, transform_indices = @transform_6, window_bounds = array<i64: 8, 1>}, {pipeline_mode = #tpu.pipeline_mode<synchronous>, transform_indices = @transform_7, window_bounds = array<i64: 9, 8, 8>}, {pipeline_mode = #tpu.pipeline_mode<synchronous>, transform_indices = @transform_8, window_bounds = array<i64: 8, 1>}, {pipeline_mode = #tpu.pipeline_mode<synchronous>, transform_indices = @transform_9, window_bounds = array<i64: 8, 1>}, {transform_indices = @transform_10, window_bounds = array<i64: 2, 8, 128>}]} {
    %c0 = arith.constant 0 : index
    %c0_0 = arith.constant 0 : index
    %0 = vector.load %arg2[%c0, %c0_0] : memref<1x128xf32, #tpu.memory_space<vmem>>, vector<1x128xf32>
    %cst = arith.constant 0.000000e+00 : f32
    %1 = vector.broadcast %cst : f32 to vector<1x128xf32>
    %2 = arith.cmpf one, %0, %1 : vector<1x128xf32>
    %cst_1 = arith.constant 0.000000e+00 : f32
    %3 = vector.broadcast %cst_1 : f32 to vector<4x512xf32>
    %c0_2 = arith.constant 0 : index
    %c0_3 = arith.constant 0 : index
    %4 = vector.load %arg12[%c0_2, %c0_3] : memref<8x512xf32, #tpu.memory_space<vmem>>, vector<4x512xf32>
    tpu.vector_store %arg12[%c0_2, %c0_3], %3 {strides = array<i32>} : memref<8x512xf32, #tpu.memory_space<vmem>>, vector<4x512xf32>,
    %c0_4 = arith.constant 0 : index
    %c0_5 = arith.constant 0 : index
    %5 = vector.load %arg3[%c0_4, %c0_5] : memref<16x8xf32, #tpu.memory_space<vmem>>, vector<16x8xf32>
    %c0_6 = arith.constant 0 : index
    %c0_7 = arith.constant 0 : index
    %6 = vector.load %arg4[%c0_6, %c0_7] : memref<16x8xf32, #tpu.memory_space<vmem>>, vector<16x8xf32>
    %c0_8 = arith.constant 0 : index
    %c0_9 = arith.constant 0 : index
    %c0_10 = arith.constant 0 : index
    %7 = vector.load %arg1[%c0_8, %c0_9, %c0_10] : memref<2x4x256xf32, #tpu.memory_space<vmem>>, vector<1x4x256xf32>
    %8 = vector.shape_cast %7 : vector<1x4x256xf32> to vector<4x256xf32>
    %9 = vector.extract_strided_slice %8 {offsets = [0, 0], sizes = [4, 16], strides = [1, 1]} : vector<4x256xf32> to vector<4x16xf32>
    %10 = vector.extract_strided_slice %8 {offsets = [0, 16], sizes = [4, 16], strides = [1, 1]} : vector<4x256xf32> to vector<4x16xf32>
    %11 = arith.maximumf %9, %10 : vector<4x16xf32>
    %cst_11 = arith.constant dense<0.000000e+00> : vector<4x8xf32>
    %12 = tpu.matmul %11, %5, %cst_11 {dimension_numbers = #tpu.dot_dimension_numbers<[1], [0], [0], [1], [0, 0, 1, 1], [], []>} : vector<4x16xf32>, vector<16x8xf32>, vector<4x8xf32> -> vector<4x8xf32>
    %cst_12 = arith.constant dense<0.000000e+00> : vector<4x8xf32>
    %13 = tpu.matmul %11, %6, %cst_12 {dimension_numbers = #tpu.dot_dimension_numbers<[1], [0], [0], [1], [0, 0, 1, 1], [], []>} : vector<4x16xf32>, vector<16x8xf32>, vector<4x8xf32> -> vector<4x8xf32>
    %14 = arith.maximumf %12, %13 : vector<4x8xf32>
    %c0_13 = arith.constant 0 : index
    %c139 = arith.constant 139 : index
    %15 = vector.load %arg12[%c0_13, %c139] : memref<8x512xf32, #tpu.memory_space<vmem>>, vector<4x8xf32>
    tpu.vector_store %arg12[%c0_13, %c139], %14 {strides = array<i32>} : memref<8x512xf32, #tpu.memory_space<vmem>>, vector<4x8xf32>,
    %16 = vector.extract_strided_slice %8 {offsets = [0, 32], sizes = [4, 16], strides = [1, 1]} : vector<4x256xf32> to vector<4x16xf32>
    %17 = vector.extract_strided_slice %8 {offsets = [0, 48], sizes = [4, 16], strides = [1, 1]} : vector<4x256xf32> to vector<4x16xf32>
    %18 = arith.maximumf %16, %17 : vector<4x16xf32>
    %cst_14 = arith.constant dense<0.000000e+00> : vector<4x8xf32>
    %19 = tpu.matmul %18, %5, %cst_14 {dimension_numbers = #tpu.dot_dimension_numbers<[1], [0], [0], [1], [0, 0, 1, 1], [], []>} : vector<4x16xf32>, vector<16x8xf32>, vector<4x8xf32> -> vector<4x8xf32>
    %cst_15 = arith.constant dense<0.000000e+00> : vector<4x8xf32>
    %20 = tpu.matmul %18, %6, %cst_15 {dimension_numbers = #tpu.dot_dimension_numbers<[1], [0], [0], [1], [0, 0, 1, 1], [], []>} : vector<4x16xf32>, vector<16x8xf32>, vector<4x8xf32> -> vector<4x8xf32>
    %21 = arith.maximumf %19, %20 : vector<4x8xf32>
    %c0_16 = arith.constant 0 : index
    %c149 = arith.constant 149 : index
    %22 = vector.load %arg12[%c0_16, %c149] : memref<8x512xf32, #tpu.memory_space<vmem>>, vector<4x8xf32>
    tpu.vector_store %arg12[%c0_16, %c149], %21 {strides = array<i32>} : memref<8x512xf32, #tpu.memory_space<vmem>>, vector<4x8xf32>,
    %23 = vector.extract_strided_slice %8 {offsets = [0, 64], sizes = [4, 16], strides = [1, 1]} : vector<4x256xf32> to vector<4x16xf32>
    %24 = vector.extract_strided_slice %8 {offsets = [0, 80], sizes = [4, 16], strides = [1, 1]} : vector<4x256xf32> to vector<4x16xf32>
    %25 = arith.maximumf %23, %24 : vector<4x16xf32>
    %cst_17 = arith.constant dense<0.000000e+00> : vector<4x8xf32>
    %26 = tpu.matmul %25, %5, %cst_17 {dimension_numbers = #tpu.dot_dimension_numbers<[1], [0], [0], [1], [0, 0, 1, 1], [], []>} : vector<4x16xf32>, vector<16x8xf32>, vector<4x8xf32> -> vector<4x8xf32>
    %cst_18 = arith.constant dense<0.000000e+00> : vector<4x8xf32>
    %27 = tpu.matmul %25, %6, %cst_18 {dimension_numbers = #tpu.dot_dimension_numbers<[1], [0], [0], [1], [0, 0, 1, 1], [], []>} : vector<4x16xf32>, vector<16x8xf32>, vector<4x8xf32> -> vector<4x8xf32>
    %28 = arith.maximumf %26, %27 : vector<4x8xf32>
    %c0_19 = arith.constant 0 : index
    %c159 = arith.constant 159 : index
    %29 = vector.load %arg12[%c0_19, %c159] : memref<8x512xf32, #tpu.memory_space<vmem>>, vector<4x8xf32>
    tpu.vector_store %arg12[%c0_19, %c159], %28 {strides = array<i32>} : memref<8x512xf32, #tpu.memory_space<vmem>>, vector<4x8xf32>,
    %30 = vector.extract_strided_slice %8 {offsets = [0, 96], sizes = [4, 16], strides = [1, 1]} : vector<4x256xf32> to vector<4x16xf32>
    %31 = vector.extract_strided_slice %8 {offsets = [0, 112], sizes = [4, 16], strides = [1, 1]} : vector<4x256xf32> to vector<4x16xf32>
    %32 = arith.maximumf %30, %31 : vector<4x16xf32>
    %cst_20 = arith.constant dense<0.000000e+00> : vector<4x8xf32>
    %33 = tpu.matmul %32, %5, %cst_20 {dimension_numbers = #tpu.dot_dimension_numbers<[1], [0], [0], [1], [0, 0, 1, 1], [], []>} : vector<4x16xf32>, vector<16x8xf32>, vector<4x8xf32> -> vector<4x8xf32>
    %cst_21 = arith.constant dense<0.000000e+00> : vector<4x8xf32>
    %34 = tpu.matmul %32, %6, %cst_21 {dimension_numbers = #tpu.dot_dimension_numbers<[1], [0], [0], [1], [0, 0, 1, 1], [], []>} : vector<4x16xf32>, vector<16x8xf32>, vector<4x8xf32> -> vector<4x8xf32>
    %35 = arith.maximumf %33, %34 : vector<4x8xf32>
    %c0_22 = arith.constant 0 : index
    %c169 = arith.constant 169 : index
    %36 = vector.load %arg12[%c0_22, %c169] : memref<8x512xf32, #tpu.memory_space<vmem>>, vector<4x8xf32>
    tpu.vector_store %arg12[%c0_22, %c169], %35 {strides = array<i32>} : memref<8x512xf32, #tpu.memory_space<vmem>>, vector<4x8xf32>,
    %37 = vector.extract_strided_slice %8 {offsets = [0, 128], sizes = [4, 16], strides = [1, 1]} : vector<4x256xf32> to vector<4x16xf32>
    %38 = vector.extract_strided_slice %8 {offsets = [0, 144], sizes = [4, 16], strides = [1, 1]} : vector<4x256xf32> to vector<4x16xf32>
    %39 = arith.maximumf %37, %38 : vector<4x16xf32>
    %cst_23 = arith.constant dense<0.000000e+00> : vector<4x8xf32>
    %40 = tpu.matmul %39, %5, %cst_23 {dimension_numbers = #tpu.dot_dimension_numbers<[1], [0], [0], [1], [0, 0, 1, 1], [], []>} : vector<4x16xf32>, vector<16x8xf32>, vector<4x8xf32> -> vector<4x8xf32>
    %cst_24 = arith.constant dense<0.000000e+00> : vector<4x8xf32>
    %41 = tpu.matmul %39, %6, %cst_24 {dimension_numbers = #tpu.dot_dimension_numbers<[1], [0], [0], [1], [0, 0, 1, 1], [], []>} : vector<4x16xf32>, vector<16x8xf32>, vector<4x8xf32> -> vector<4x8xf32>
    %42 = arith.maximumf %40, %41 : vector<4x8xf32>
    %c0_25 = arith.constant 0 : index
    %c179 = arith.constant 179 : index
    %43 = vector.load %arg12[%c0_25, %c179] : memref<8x512xf32, #tpu.memory_space<vmem>>, vector<4x8xf32>
    tpu.vector_store %arg12[%c0_25, %c179], %42 {strides = array<i32>} : memref<8x512xf32, #tpu.memory_space<vmem>>, vector<4x8xf32>,
    %44 = vector.extract_strided_slice %8 {offsets = [0, 160], sizes = [4, 16], strides = [1, 1]} : vector<4x256xf32> to vector<4x16xf32>
    %45 = vector.extract_strided_slice %8 {offsets = [0, 176], sizes = [4, 16], strides = [1, 1]} : vector<4x256xf32> to vector<4x16xf32>
    %46 = arith.maximumf %44, %45 : vector<4x16xf32>
    %cst_26 = arith.constant dense<0.000000e+00> : vector<4x8xf32>
    %47 = tpu.matmul %46, %5, %cst_26 {dimension_numbers = #tpu.dot_dimension_numbers<[1], [0], [0], [1], [0, 0, 1, 1], [], []>} : vector<4x16xf32>, vector<16x8xf32>, vector<4x8xf32> -> vector<4x8xf32>
    %cst_27 = arith.constant dense<0.000000e+00> : vector<4x8xf32>
    %48 = tpu.matmul %46, %6, %cst_27 {dimension_numbers = #tpu.dot_dimension_numbers<[1], [0], [0], [1], [0, 0, 1, 1], [], []>} : vector<4x16xf32>, vector<16x8xf32>, vector<4x8xf32> -> vector<4x8xf32>
    %49 = arith.maximumf %47, %48 : vector<4x8xf32>
    %c0_28 = arith.constant 0 : index
    %c189 = arith.constant 189 : index
    %50 = vector.load %arg12[%c0_28, %c189] : memref<8x512xf32, #tpu.memory_space<vmem>>, vector<4x8xf32>
    tpu.vector_store %arg12[%c0_28, %c189], %49 {strides = array<i32>} : memref<8x512xf32, #tpu.memory_space<vmem>>, vector<4x8xf32>,
    %51 = vector.extract_strided_slice %8 {offsets = [0, 192], sizes = [4, 16], strides = [1, 1]} : vector<4x256xf32> to vector<4x16xf32>
    %52 = vector.extract_strided_slice %8 {offsets = [0, 208], sizes = [4, 16], strides = [1, 1]} : vector<4x256xf32> to vector<4x16xf32>
    %53 = arith.maximumf %51, %52 : vector<4x16xf32>
    %cst_29 = arith.constant dense<0.000000e+00> : vector<4x8xf32>
    %54 = tpu.matmul %53, %5, %cst_29 {dimension_numbers = #tpu.dot_dimension_numbers<[1], [0], [0], [1], [0, 0, 1, 1], [], []>} : vector<4x16xf32>, vector<16x8xf32>, vector<4x8xf32> -> vector<4x8xf32>
    %cst_30 = arith.constant dense<0.000000e+00> : vector<4x8xf32>
    %55 = tpu.matmul %53, %6, %cst_30 {dimension_numbers = #tpu.dot_dimension_numbers<[1], [0], [0], [1], [0, 0, 1, 1], [], []>} : vector<4x16xf32>, vector<16x8xf32>, vector<4x8xf32> -> vector<4x8xf32>
    %56 = arith.maximumf %54, %55 : vector<4x8xf32>
    %c0_31 = arith.constant 0 : index
    %c199 = arith.constant 199 : index
    %57 = vector.load %arg12[%c0_31, %c199] : memref<8x512xf32, #tpu.memory_space<vmem>>, vector<4x8xf32>
    tpu.vector_store %arg12[%c0_31, %c199], %56 {strides = array<i32>} : memref<8x512xf32, #tpu.memory_space<vmem>>, vector<4x8xf32>,
    %58 = vector.extract_strided_slice %8 {offsets = [0, 224], sizes = [4, 16], strides = [1, 1]} : vector<4x256xf32> to vector<4x16xf32>
    %59 = vector.extract_strided_slice %8 {offsets = [0, 240], sizes = [4, 16], strides = [1, 1]} : vector<4x256xf32> to vector<4x16xf32>
    %60 = arith.maximumf %58, %59 : vector<4x16xf32>
    %cst_32 = arith.constant dense<0.000000e+00> : vector<4x8xf32>
    %61 = tpu.matmul %60, %5, %cst_32 {dimension_numbers = #tpu.dot_dimension_numbers<[1], [0], [0], [1], [0, 0, 1, 1], [], []>} : vector<4x16xf32>, vector<16x8xf32>, vector<4x8xf32> -> vector<4x8xf32>
    %cst_33 = arith.constant dense<0.000000e+00> : vector<4x8xf32>
    %62 = tpu.matmul %60, %6, %cst_33 {dimension_numbers = #tpu.dot_dimension_numbers<[1], [0], [0], [1], [0, 0, 1, 1], [], []>} : vector<4x16xf32>, vector<16x8xf32>, vector<4x8xf32> -> vector<4x8xf32>
    %63 = arith.maximumf %61, %62 : vector<4x8xf32>
    %c0_34 = arith.constant 0 : index
    %c209 = arith.constant 209 : index
    %64 = vector.load %arg12[%c0_34, %c209] : memref<8x512xf32, #tpu.memory_space<vmem>>, vector<4x8xf32>
    tpu.vector_store %arg12[%c0_34, %c209], %63 {strides = array<i32>} : memref<8x512xf32, #tpu.memory_space<vmem>>, vector<4x8xf32>,
    %c1 = arith.constant 1 : index
    %c0_35 = arith.constant 0 : index
    %c0_36 = arith.constant 0 : index
    %65 = vector.load %arg1[%c1, %c0_35, %c0_36] : memref<2x4x256xf32, #tpu.memory_space<vmem>>, vector<1x4x256xf32>
    %66 = vector.shape_cast %65 : vector<1x4x256xf32> to vector<4x256xf32>
    %67 = vector.extract_strided_slice %66 {offsets = [0, 0], sizes = [4, 16], strides = [1, 1]} : vector<4x256xf32> to vector<4x16xf32>
    %68 = vector.extract_strided_slice %66 {offsets = [0, 16], sizes = [4, 16], strides = [1, 1]} : vector<4x256xf32> to vector<4x16xf32>
    %69 = arith.maximumf %67, %68 : vector<4x16xf32>
    %cst_37 = arith.constant dense<0.000000e+00> : vector<4x8xf32>
    %70 = tpu.matmul %69, %5, %cst_37 {dimension_numbers = #tpu.dot_dimension_numbers<[1], [0], [0], [1], [0, 0, 1, 1], [], []>} : vector<4x16xf32>, vector<16x8xf32>, vector<4x8xf32> -> vector<4x8xf32>
    %cst_38 = arith.constant dense<0.000000e+00> : vector<4x8xf32>
    %71 = tpu.matmul %69, %6, %cst_38 {dimension_numbers = #tpu.dot_dimension_numbers<[1], [0], [0], [1], [0, 0, 1, 1], [], []>} : vector<4x16xf32>, vector<16x8xf32>, vector<4x8xf32> -> vector<4x8xf32>
    %72 = arith.maximumf %70, %71 : vector<4x8xf32>
    %c0_39 = arith.constant 0 : index
    %c267 = arith.constant 267 : index
    %73 = vector.load %arg12[%c0_39, %c267] : memref<8x512xf32, #tpu.memory_space<vmem>>, vector<4x8xf32>
    tpu.vector_store %arg12[%c0_39, %c267], %72 {strides = array<i32>} : memref<8x512xf32, #tpu.memory_space<vmem>>, vector<4x8xf32>,
    %74 = vector.extract_strided_slice %66 {offsets = [0, 32], sizes = [4, 16], strides = [1, 1]} : vector<4x256xf32> to vector<4x16xf32>
    %75 = vector.extract_strided_slice %66 {offsets = [0, 48], sizes = [4, 16], strides = [1, 1]} : vector<4x256xf32> to vector<4x16xf32>
    %76 = arith.maximumf %74, %75 : vector<4x16xf32>
    %cst_40 = arith.constant dense<0.000000e+00> : vector<4x8xf32>
    %77 = tpu.matmul %76, %5, %cst_40 {dimension_numbers = #tpu.dot_dimension_numbers<[1], [0], [0], [1], [0, 0, 1, 1], [], []>} : vector<4x16xf32>, vector<16x8xf32>, vector<4x8xf32> -> vector<4x8xf32>
    %cst_41 = arith.constant dense<0.000000e+00> : vector<4x8xf32>
    %78 = tpu.matmul %76, %6, %cst_41 {dimension_numbers = #tpu.dot_dimension_numbers<[1], [0], [0], [1], [0, 0, 1, 1], [], []>} : vector<4x16xf32>, vector<16x8xf32>, vector<4x8xf32> -> vector<4x8xf32>
    %79 = arith.maximumf %77, %78 : vector<4x8xf32>
    %c0_42 = arith.constant 0 : index
    %c277 = arith.constant 277 : index
    %80 = vector.load %arg12[%c0_42, %c277] : memref<8x512xf32, #tpu.memory_space<vmem>>, vector<4x8xf32>
    tpu.vector_store %arg12[%c0_42, %c277], %79 {strides = array<i32>} : memref<8x512xf32, #tpu.memory_space<vmem>>, vector<4x8xf32>,
    %81 = vector.extract_strided_slice %66 {offsets = [0, 64], sizes = [4, 16], strides = [1, 1]} : vector<4x256xf32> to vector<4x16xf32>
    %82 = vector.extract_strided_slice %66 {offsets = [0, 80], sizes = [4, 16], strides = [1, 1]} : vector<4x256xf32> to vector<4x16xf32>
    %83 = arith.maximumf %81, %82 : vector<4x16xf32>
    %cst_43 = arith.constant dense<0.000000e+00> : vector<4x8xf32>
    %84 = tpu.matmul %83, %5, %cst_43 {dimension_numbers = #tpu.dot_dimension_numbers<[1], [0], [0], [1], [0, 0, 1, 1], [], []>} : vector<4x16xf32>, vector<16x8xf32>, vector<4x8xf32> -> vector<4x8xf32>
    %cst_44 = arith.constant dense<0.000000e+00> : vector<4x8xf32>
    %85 = tpu.matmul %83, %6, %cst_44 {dimension_numbers = #tpu.dot_dimension_numbers<[1], [0], [0], [1], [0, 0, 1, 1], [], []>} : vector<4x16xf32>, vector<16x8xf32>, vector<4x8xf32> -> vector<4x8xf32>
    %86 = arith.maximumf %84, %85 : vector<4x8xf32>
    %c0_45 = arith.constant 0 : index
    %c287 = arith.constant 287 : index
    %87 = vector.load %arg12[%c0_45, %c287] : memref<8x512xf32, #tpu.memory_space<vmem>>, vector<4x8xf32>
    tpu.vector_store %arg12[%c0_45, %c287], %86 {strides = array<i32>} : memref<8x512xf32, #tpu.memory_space<vmem>>, vector<4x8xf32>,
    %88 = vector.extract_strided_slice %66 {offsets = [0, 96], sizes = [4, 16], strides = [1, 1]} : vector<4x256xf32> to vector<4x16xf32>
    %89 = vector.extract_strided_slice %66 {offsets = [0, 112], sizes = [4, 16], strides = [1, 1]} : vector<4x256xf32> to vector<4x16xf32>
    %90 = arith.maximumf %88, %89 : vector<4x16xf32>
    %cst_46 = arith.constant dense<0.000000e+00> : vector<4x8xf32>
    %91 = tpu.matmul %90, %5, %cst_46 {dimension_numbers = #tpu.dot_dimension_numbers<[1], [0], [0], [1], [0, 0, 1, 1], [], []>} : vector<4x16xf32>, vector<16x8xf32>, vector<4x8xf32> -> vector<4x8xf32>
    %cst_47 = arith.constant dense<0.000000e+00> : vector<4x8xf32>
    %92 = tpu.matmul %90, %6, %cst_47 {dimension_numbers = #tpu.dot_dimension_numbers<[1], [0], [0], [1], [0, 0, 1, 1], [], []>} : vector<4x16xf32>, vector<16x8xf32>, vector<4x8xf32> -> vector<4x8xf32>
    %93 = arith.maximumf %91, %92 : vector<4x8xf32>
    %c0_48 = arith.constant 0 : index
    %c297 = arith.constant 297 : index
    %94 = vector.load %arg12[%c0_48, %c297] : memref<8x512xf32, #tpu.memory_space<vmem>>, vector<4x8xf32>
    tpu.vector_store %arg12[%c0_48, %c297], %93 {strides = array<i32>} : memref<8x512xf32, #tpu.memory_space<vmem>>, vector<4x8xf32>,
    %95 = vector.extract_strided_slice %66 {offsets = [0, 128], sizes = [4, 16], strides = [1, 1]} : vector<4x256xf32> to vector<4x16xf32>
    %96 = vector.extract_strided_slice %66 {offsets = [0, 144], sizes = [4, 16], strides = [1, 1]} : vector<4x256xf32> to vector<4x16xf32>
    %97 = arith.maximumf %95, %96 : vector<4x16xf32>
    %cst_49 = arith.constant dense<0.000000e+00> : vector<4x8xf32>
    %98 = tpu.matmul %97, %5, %cst_49 {dimension_numbers = #tpu.dot_dimension_numbers<[1], [0], [0], [1], [0, 0, 1, 1], [], []>} : vector<4x16xf32>, vector<16x8xf32>, vector<4x8xf32> -> vector<4x8xf32>
    %cst_50 = arith.constant dense<0.000000e+00> : vector<4x8xf32>
    %99 = tpu.matmul %97, %6, %cst_50 {dimension_numbers = #tpu.dot_dimension_numbers<[1], [0], [0], [1], [0, 0, 1, 1], [], []>} : vector<4x16xf32>, vector<16x8xf32>, vector<4x8xf32> -> vector<4x8xf32>
    %100 = arith.maximumf %98, %99 : vector<4x8xf32>
    %c0_51 = arith.constant 0 : index
    %c307 = arith.constant 307 : index
    %101 = vector.load %arg12[%c0_51, %c307] : memref<8x512xf32, #tpu.memory_space<vmem>>, vector<4x8xf32>
    tpu.vector_store %arg12[%c0_51, %c307], %100 {strides = array<i32>} : memref<8x512xf32, #tpu.memory_space<vmem>>, vector<4x8xf32>,
    %102 = vector.extract_strided_slice %66 {offsets = [0, 160], sizes = [4, 16], strides = [1, 1]} : vector<4x256xf32> to vector<4x16xf32>
    %103 = vector.extract_strided_slice %66 {offsets = [0, 176], sizes = [4, 16], strides = [1, 1]} : vector<4x256xf32> to vector<4x16xf32>
    %104 = arith.maximumf %102, %103 : vector<4x16xf32>
    %cst_52 = arith.constant dense<0.000000e+00> : vector<4x8xf32>
    %105 = tpu.matmul %104, %5, %cst_52 {dimension_numbers = #tpu.dot_dimension_numbers<[1], [0], [0], [1], [0, 0, 1, 1], [], []>} : vector<4x16xf32>, vector<16x8xf32>, vector<4x8xf32> -> vector<4x8xf32>
    %cst_53 = arith.constant dense<0.000000e+00> : vector<4x8xf32>
    %106 = tpu.matmul %104, %6, %cst_53 {dimension_numbers = #tpu.dot_dimension_numbers<[1], [0], [0], [1], [0, 0, 1, 1], [], []>} : vector<4x16xf32>, vector<16x8xf32>, vector<4x8xf32> -> vector<4x8xf32>
    %107 = arith.maximumf %105, %106 : vector<4x8xf32>
    %c0_54 = arith.constant 0 : index
    %c317 = arith.constant 317 : index
    %108 = vector.load %arg12[%c0_54, %c317] : memref<8x512xf32, #tpu.memory_space<vmem>>, vector<4x8xf32>
    tpu.vector_store %arg12[%c0_54, %c317], %107 {strides = array<i32>} : memref<8x512xf32, #tpu.memory_space<vmem>>, vector<4x8xf32>,
    %109 = vector.extract_strided_slice %66 {offsets = [0, 192], sizes = [4, 16], strides = [1, 1]} : vector<4x256xf32> to vector<4x16xf32>
    %110 = vector.extract_strided_slice %66 {offsets = [0, 208], sizes = [4, 16], strides = [1, 1]} : vector<4x256xf32> to vector<4x16xf32>
    %111 = arith.maximumf %109, %110 : vector<4x16xf32>
    %cst_55 = arith.constant dense<0.000000e+00> : vector<4x8xf32>
    %112 = tpu.matmul %111, %5, %cst_55 {dimension_numbers = #tpu.dot_dimension_numbers<[1], [0], [0], [1], [0, 0, 1, 1], [], []>} : vector<4x16xf32>, vector<16x8xf32>, vector<4x8xf32> -> vector<4x8xf32>
    %cst_56 = arith.constant dense<0.000000e+00> : vector<4x8xf32>
    %113 = tpu.matmul %111, %6, %cst_56 {dimension_numbers = #tpu.dot_dimension_numbers<[1], [0], [0], [1], [0, 0, 1, 1], [], []>} : vector<4x16xf32>, vector<16x8xf32>, vector<4x8xf32> -> vector<4x8xf32>
    %114 = arith.maximumf %112, %113 : vector<4x8xf32>
    %c0_57 = arith.constant 0 : index
    %c327 = arith.constant 327 : index
    %115 = vector.load %arg12[%c0_57, %c327] : memref<8x512xf32, #tpu.memory_space<vmem>>, vector<4x8xf32>
    tpu.vector_store %arg12[%c0_57, %c327], %114 {strides = array<i32>} : memref<8x512xf32, #tpu.memory_space<vmem>>, vector<4x8xf32>,
    %116 = vector.extract_strided_slice %66 {offsets = [0, 224], sizes = [4, 16], strides = [1, 1]} : vector<4x256xf32> to vector<4x16xf32>
    %117 = vector.extract_strided_slice %66 {offsets = [0, 240], sizes = [4, 16], strides = [1, 1]} : vector<4x256xf32> to vector<4x16xf32>
    %118 = arith.maximumf %116, %117 : vector<4x16xf32>
    %cst_58 = arith.constant dense<0.000000e+00> : vector<4x8xf32>
    %119 = tpu.matmul %118, %5, %cst_58 {dimension_numbers = #tpu.dot_dimension_numbers<[1], [0], [0], [1], [0, 0, 1, 1], [], []>} : vector<4x16xf32>, vector<16x8xf32>, vector<4x8xf32> -> vector<4x8xf32>
    %cst_59 = arith.constant dense<0.000000e+00> : vector<4x8xf32>
    %120 = tpu.matmul %118, %6, %cst_59 {dimension_numbers = #tpu.dot_dimension_numbers<[1], [0], [0], [1], [0, 0, 1, 1], [], []>} : vector<4x16xf32>, vector<16x8xf32>, vector<4x8xf32> -> vector<4x8xf32>
    %121 = arith.maximumf %119, %120 : vector<4x8xf32>
    %c0_60 = arith.constant 0 : index
    %c337 = arith.constant 337 : index
    %122 = vector.load %arg12[%c0_60, %c337] : memref<8x512xf32, #tpu.memory_space<vmem>>, vector<4x8xf32>
    tpu.vector_store %arg12[%c0_60, %c337], %121 {strides = array<i32>} : memref<8x512xf32, #tpu.memory_space<vmem>>, vector<4x8xf32>,
    %c0_61 = arith.constant 0 : index
    %c117 = arith.constant 117 : index
    %123 = vector.load %arg12[%c0_61, %c117] : memref<8x512xf32, #tpu.memory_space<vmem>>, vector<4x256xf32>
    %c0_62 = arith.constant 0 : index
    %c0_63 = arith.constant 0 : index
    %c0_64 = arith.constant 0 : index
    %124 = vector.load %arg5[%c0_62, %c0_63, %c0_64] : memref<9x8x4xf32, #tpu.memory_space<vmem>>, vector<1x8x4xf32>
    %125 = vector.shape_cast %124 : vector<1x8x4xf32> to vector<8x4xf32>
    %cst_65 = arith.constant dense<0.000000e+00> : vector<8x256xf32>
    %126 = tpu.matmul %125, %123, %cst_65 {dimension_numbers = #tpu.dot_dimension_numbers<[1], [0], [0], [1], [0, 0, 1, 1], [], []>} : vector<8x4xf32>, vector<4x256xf32>, vector<8x256xf32> -> vector<8x256xf32>
    %c0_66 = arith.constant 0 : index
    %c118 = arith.constant 118 : index
    %127 = vector.load %arg12[%c0_66, %c118] : memref<8x512xf32, #tpu.memory_space<vmem>>, vector<4x256xf32>
    %c1_67 = arith.constant 1 : index
    %c0_68 = arith.constant 0 : index
    %c0_69 = arith.constant 0 : index
    %128 = vector.load %arg5[%c1_67, %c0_68, %c0_69] : memref<9x8x4xf32, #tpu.memory_space<vmem>>, vector<1x8x4xf32>
    %129 = vector.shape_cast %128 : vector<1x8x4xf32> to vector<8x4xf32>
    %cst_70 = arith.constant dense<0.000000e+00> : vector<8x256xf32>
    %130 = tpu.matmul %129, %127, %cst_70 {dimension_numbers = #tpu.dot_dimension_numbers<[1], [0], [0], [1], [0, 0, 1, 1], [], []>} : vector<8x4xf32>, vector<4x256xf32>, vector<8x256xf32> -> vector<8x256xf32>
    %131 = arith.addf %126, %130 : vector<8x256xf32>
    %c0_71 = arith.constant 0 : index
    %c119 = arith.constant 119 : index
    %132 = vector.load %arg12[%c0_71, %c119] : memref<8x512xf32, #tpu.memory_space<vmem>>, vector<4x256xf32>
    %c2 = arith.constant 2 : index
    %c0_72 = arith.constant 0 : index
    %c0_73 = arith.constant 0 : index
    %133 = vector.load %arg5[%c2, %c0_72, %c0_73] : memref<9x8x4xf32, #tpu.memory_space<vmem>>, vector<1x8x4xf32>
    %134 = vector.shape_cast %133 : vector<1x8x4xf32> to vector<8x4xf32>
    %cst_74 = arith.constant dense<0.000000e+00> : vector<8x256xf32>
    %135 = tpu.matmul %134, %132, %cst_74 {dimension_numbers = #tpu.dot_dimension_numbers<[1], [0], [0], [1], [0, 0, 1, 1], [], []>} : vector<8x4xf32>, vector<4x256xf32>, vector<8x256xf32> -> vector<8x256xf32>
    %136 = arith.addf %131, %135 : vector<8x256xf32>
    %c0_75 = arith.constant 0 : index
    %c127 = arith.constant 127 : index
    %137 = vector.load %arg12[%c0_75, %c127] : memref<8x512xf32, #tpu.memory_space<vmem>>, vector<4x256xf32>
    %c3 = arith.constant 3 : index
    %c0_76 = arith.constant 0 : index
    %c0_77 = arith.constant 0 : index
    %138 = vector.load %arg5[%c3, %c0_76, %c0_77] : memref<9x8x4xf32, #tpu.memory_space<vmem>>, vector<1x8x4xf32>
    %139 = vector.shape_cast %138 : vector<1x8x4xf32> to vector<8x4xf32>
    %cst_78 = arith.constant dense<0.000000e+00> : vector<8x256xf32>
    %140 = tpu.matmul %139, %137, %cst_78 {dimension_numbers = #tpu.dot_dimension_numbers<[1], [0], [0], [1], [0, 0, 1, 1], [], []>} : vector<8x4xf32>, vector<4x256xf32>, vector<8x256xf32> -> vector<8x256xf32>
    %141 = arith.addf %136, %140 : vector<8x256xf32>
    %c0_79 = arith.constant 0 : index
    %c128 = arith.constant 128 : index
    %142 = vector.load %arg12[%c0_79, %c128] : memref<8x512xf32, #tpu.memory_space<vmem>>, vector<4x256xf32>
    %c4 = arith.constant 4 : index
    %c0_80 = arith.constant 0 : index
    %c0_81 = arith.constant 0 : index
    %143 = vector.load %arg5[%c4, %c0_80, %c0_81] : memref<9x8x4xf32, #tpu.memory_space<vmem>>, vector<1x8x4xf32>
    %144 = vector.shape_cast %143 : vector<1x8x4xf32> to vector<8x4xf32>
    %cst_82 = arith.constant dense<0.000000e+00> : vector<8x256xf32>
    %145 = tpu.matmul %144, %142, %cst_82 {dimension_numbers = #tpu.dot_dimension_numbers<[1], [0], [0], [1], [0, 0, 1, 1], [], []>} : vector<8x4xf32>, vector<4x256xf32>, vector<8x256xf32> -> vector<8x256xf32>
    %146 = arith.addf %141, %145 : vector<8x256xf32>
    %c0_83 = arith.constant 0 : index
    %c129 = arith.constant 129 : index
    %147 = vector.load %arg12[%c0_83, %c129] : memref<8x512xf32, #tpu.memory_space<vmem>>, vector<4x256xf32>
    %c5 = arith.constant 5 : index
    %c0_84 = arith.constant 0 : index
    %c0_85 = arith.constant 0 : index
    %148 = vector.load %arg5[%c5, %c0_84, %c0_85] : memref<9x8x4xf32, #tpu.memory_space<vmem>>, vector<1x8x4xf32>
    %149 = vector.shape_cast %148 : vector<1x8x4xf32> to vector<8x4xf32>
    %cst_86 = arith.constant dense<0.000000e+00> : vector<8x256xf32>
    %150 = tpu.matmul %149, %147, %cst_86 {dimension_numbers = #tpu.dot_dimension_numbers<[1], [0], [0], [1], [0, 0, 1, 1], [], []>} : vector<8x4xf32>, vector<4x256xf32>, vector<8x256xf32> -> vector<8x256xf32>
    %151 = arith.addf %146, %150 : vector<8x256xf32>
    %c0_87 = arith.constant 0 : index
    %c137 = arith.constant 137 : index
    %152 = vector.load %arg12[%c0_87, %c137] : memref<8x512xf32, #tpu.memory_space<vmem>>, vector<4x256xf32>
    %c6 = arith.constant 6 : index
    %c0_88 = arith.constant 0 : index
    %c0_89 = arith.constant 0 : index
    %153 = vector.load %arg5[%c6, %c0_88, %c0_89] : memref<9x8x4xf32, #tpu.memory_space<vmem>>, vector<1x8x4xf32>
    %154 = vector.shape_cast %153 : vector<1x8x4xf32> to vector<8x4xf32>
    %cst_90 = arith.constant dense<0.000000e+00> : vector<8x256xf32>
    %155 = tpu.matmul %154, %152, %cst_90 {dimension_numbers = #tpu.dot_dimension_numbers<[1], [0], [0], [1], [0, 0, 1, 1], [], []>} : vector<8x4xf32>, vector<4x256xf32>, vector<8x256xf32> -> vector<8x256xf32>
    %156 = arith.addf %151, %155 : vector<8x256xf32>
    %c0_91 = arith.constant 0 : index
    %c138 = arith.constant 138 : index
    %157 = vector.load %arg12[%c0_91, %c138] : memref<8x512xf32, #tpu.memory_space<vmem>>, vector<4x256xf32>
    %c7 = arith.constant 7 : index
    %c0_92 = arith.constant 0 : index
    %c0_93 = arith.constant 0 : index
    %158 = vector.load %arg5[%c7, %c0_92, %c0_93] : memref<9x8x4xf32, #tpu.memory_space<vmem>>, vector<1x8x4xf32>
    %159 = vector.shape_cast %158 : vector<1x8x4xf32> to vector<8x4xf32>
    %cst_94 = arith.constant dense<0.000000e+00> : vector<8x256xf32>
    %160 = tpu.matmul %159, %157, %cst_94 {dimension_numbers = #tpu.dot_dimension_numbers<[1], [0], [0], [1], [0, 0, 1, 1], [], []>} : vector<8x4xf32>, vector<4x256xf32>, vector<8x256xf32> -> vector<8x256xf32>
    %161 = arith.addf %156, %160 : vector<8x256xf32>
    %c0_95 = arith.constant 0 : index
    %c139_96 = arith.constant 139 : index
    %162 = vector.load %arg12[%c0_95, %c139_96] : memref<8x512xf32, #tpu.memory_space<vmem>>, vector<4x256xf32>
    %c8 = arith.constant 8 : index
    %c0_97 = arith.constant 0 : index
    %c0_98 = arith.constant 0 : index
    %163 = vector.load %arg5[%c8, %c0_97, %c0_98] : memref<9x8x4xf32, #tpu.memory_space<vmem>>, vector<1x8x4xf32>
    %164 = vector.shape_cast %163 : vector<1x8x4xf32> to vector<8x4xf32>
    %cst_99 = arith.constant dense<0.000000e+00> : vector<8x256xf32>
    %165 = tpu.matmul %164, %162, %cst_99 {dimension_numbers = #tpu.dot_dimension_numbers<[1], [0], [0], [1], [0, 0, 1, 1], [], []>} : vector<8x4xf32>, vector<4x256xf32>, vector<8x256xf32> -> vector<8x256xf32>
    %166 = arith.addf %161, %165 : vector<8x256xf32>
    %c0_100 = arith.constant 0 : index
    %c0_101 = arith.constant 0 : index
    %167 = vector.load %arg6[%c0_100, %c0_101] : memref<8x1xf32, #tpu.memory_space<vmem>>, vector<8x1xf32>
    %c0_102 = arith.constant 0 : index
    %c0_103 = arith.constant 0 : index
    %168 = vector.load %arg7[%c0_102, %c0_103] : memref<8x1xf32, #tpu.memory_space<vmem>>, vector<8x1xf32>
    %169 = vector.extract_strided_slice %166 {offsets = [0, 0], sizes = [8, 128], strides = [1, 1]} : vector<8x256xf32> to vector<8x128xf32>
    %cst_104 = arith.constant 0.000000e+00 : f32
    %170 = vector.shape_cast %2 : vector<1x128xi1> to vector<1x128xi1>
    %171 = vector.broadcast %170 : vector<1x128xi1> to vector<8x128xi1>
    %172 = vector.broadcast %cst_104 : f32 to vector<8x128xf32>
    %173 = arith.select %171, %169, %172 : vector<8x128xi1>, vector<8x128xf32>
    %cst_105 = arith.constant dense<0.000000e+00> : vector<8xf32>
    %174 = vector.multi_reduction <add>, %173, %cst_105 [1] : vector<8x128xf32> to vector<8xf32>
    %175 = vector.shape_cast %174 : vector<8xf32> to vector<8x1xf32>
    %176 = arith.mulf %173, %173 : vector<8x128xf32>
    %cst_106 = arith.constant dense<0.000000e+00> : vector<8xf32>
    %177 = vector.multi_reduction <add>, %176, %cst_106 [1] : vector<8x128xf32> to vector<8xf32>
    %178 = vector.shape_cast %177 : vector<8xf32> to vector<8x1xf32>
    %cst_107 = arith.constant 1.562500e-02 : f32
    %179 = vector.broadcast %cst_107 : f32 to vector<8x1xf32>
    %180 = arith.mulf %175, %179 : vector<8x1xf32>
    %181 = arith.mulf %175, %180 : vector<8x1xf32>
    %182 = arith.subf %178, %181 : vector<8x1xf32>
    %cst_108 = arith.constant 0.0158730168 : f32
    %183 = vector.broadcast %cst_108 : f32 to vector<8x1xf32>
    %184 = arith.mulf %182, %183 : vector<8x1xf32>
    %cst_109 = arith.constant 0.000000e+00 : f32
    %185 = vector.broadcast %cst_109 : f32 to vector<8x1xf32>
    %186 = arith.maximumf %184, %185 : vector<8x1xf32>
    %187 = math.sqrt %186 : vector<8x1xf32>
    %cst_110 = arith.constant 1.000000e-03 : f32
    %188 = vector.broadcast %cst_110 : f32 to vector<8x1xf32>
    %189 = arith.addf %187, %188 : vector<8x1xf32>
    %190 = math.rsqrt %189 : vector<8x1xf32>
    %191 = vector.broadcast %180 : vector<8x1xf32> to vector<8x128xf32>
    %192 = arith.subf %169, %191 : vector<8x128xf32>
    %193 = vector.broadcast %190 : vector<8x1xf32> to vector<8x128xf32>
    %194 = arith.mulf %192, %193 : vector<8x128xf32>
    %195 = vector.broadcast %167 : vector<8x1xf32> to vector<8x128xf32>
    %196 = arith.mulf %195, %194 : vector<8x128xf32>
    %197 = vector.broadcast %168 : vector<8x1xf32> to vector<8x128xf32>
    %198 = arith.addf %196, %197 : vector<8x128xf32>
    %cst_111 = arith.constant 0.000000e+00 : f32
    %199 = vector.broadcast %cst_111 : f32 to vector<8x128xf32>
    %200 = arith.maximumf %198, %199 : vector<8x128xf32>
    %cst_112 = arith.constant 0.000000e+00 : f32
    %201 = vector.shape_cast %2 : vector<1x128xi1> to vector<1x128xi1>
    %202 = vector.broadcast %201 : vector<1x128xi1> to vector<8x128xi1>
    %203 = vector.broadcast %cst_112 : f32 to vector<8x128xf32>
    %204 = arith.select %202, %200, %203 : vector<8x128xi1>, vector<8x128xf32>
    %c0_113 = arith.constant 0 : index
    %c128_114 = arith.constant 128 : index
    %205 = vector.load %arg12[%c0_113, %c128_114] : memref<8x512xf32, #tpu.memory_space<vmem>>, vector<8x128xf32>
    tpu.vector_store %arg12[%c0_113, %c128_114], %204 {strides = array<i32>} : memref<8x512xf32, #tpu.memory_space<vmem>>, vector<8x128xf32>,
    %206 = vector.extract_strided_slice %166 {offsets = [0, 128], sizes = [8, 128], strides = [1, 1]} : vector<8x256xf32> to vector<8x128xf32>
    %cst_115 = arith.constant 0.000000e+00 : f32
    %207 = vector.shape_cast %2 : vector<1x128xi1> to vector<1x128xi1>
    %208 = vector.broadcast %207 : vector<1x128xi1> to vector<8x128xi1>
    %209 = vector.broadcast %cst_115 : f32 to vector<8x128xf32>
    %210 = arith.select %208, %206, %209 : vector<8x128xi1>, vector<8x128xf32>
    %cst_116 = arith.constant dense<0.000000e+00> : vector<8xf32>
    %211 = vector.multi_reduction <add>, %210, %cst_116 [1] : vector<8x128xf32> to vector<8xf32>
    %212 = vector.shape_cast %211 : vector<8xf32> to vector<8x1xf32>
    %213 = arith.mulf %210, %210 : vector<8x128xf32>
    %cst_117 = arith.constant dense<0.000000e+00> : vector<8xf32>
    %214 = vector.multi_reduction <add>, %213, %cst_117 [1] : vector<8x128xf32> to vector<8xf32>
    %215 = vector.shape_cast %214 : vector<8xf32> to vector<8x1xf32>
    %cst_118 = arith.constant 1.562500e-02 : f32
    %216 = vector.broadcast %cst_118 : f32 to vector<8x1xf32>
    %217 = arith.mulf %212, %216 : vector<8x1xf32>
    %218 = arith.mulf %212, %217 : vector<8x1xf32>
    %219 = arith.subf %215, %218 : vector<8x1xf32>
    %cst_119 = arith.constant 0.0158730168 : f32
    %220 = vector.broadcast %cst_119 : f32 to vector<8x1xf32>
    %221 = arith.mulf %219, %220 : vector<8x1xf32>
    %cst_120 = arith.constant 0.000000e+00 : f32
    %222 = vector.broadcast %cst_120 : f32 to vector<8x1xf32>
    %223 = arith.maximumf %221, %222 : vector<8x1xf32>
    %224 = math.sqrt %223 : vector<8x1xf32>
    %cst_121 = arith.constant 1.000000e-03 : f32
    %225 = vector.broadcast %cst_121 : f32 to vector<8x1xf32>
    %226 = arith.addf %224, %225 : vector<8x1xf32>
    %227 = math.rsqrt %226 : vector<8x1xf32>
    %228 = vector.broadcast %217 : vector<8x1xf32> to vector<8x128xf32>
    %229 = arith.subf %206, %228 : vector<8x128xf32>
    %230 = vector.broadcast %227 : vector<8x1xf32> to vector<8x128xf32>
    %231 = arith.mulf %229, %230 : vector<8x128xf32>
    %232 = vector.broadcast %167 : vector<8x1xf32> to vector<8x128xf32>
    %233 = arith.mulf %232, %231 : vector<8x128xf32>
    %234 = vector.broadcast %168 : vector<8x1xf32> to vector<8x128xf32>
    %235 = arith.addf %233, %234 : vector<8x128xf32>
    %cst_122 = arith.constant 0.000000e+00 : f32
    %236 = vector.broadcast %cst_122 : f32 to vector<8x128xf32>
    %237 = arith.maximumf %235, %236 : vector<8x128xf32>
    %cst_123 = arith.constant 0.000000e+00 : f32
    %238 = vector.shape_cast %2 : vector<1x128xi1> to vector<1x128xi1>
    %239 = vector.broadcast %238 : vector<1x128xi1> to vector<8x128xi1>
    %240 = vector.broadcast %cst_123 : f32 to vector<8x128xf32>
    %241 = arith.select %239, %237, %240 : vector<8x128xi1>, vector<8x128xf32>
    %c0_124 = arith.constant 0 : index
    %c256 = arith.constant 256 : index
    %242 = vector.load %arg12[%c0_124, %c256] : memref<8x512xf32, #tpu.memory_space<vmem>>, vector<8x128xf32>
    tpu.vector_store %arg12[%c0_124, %c256], %241 {strides = array<i32>} : memref<8x512xf32, #tpu.memory_space<vmem>>, vector<8x128xf32>,
    %c0_125 = arith.constant 0 : index
    %c117_126 = arith.constant 117 : index
    %243 = vector.load %arg12[%c0_125, %c117_126] : memref<8x512xf32, #tpu.memory_space<vmem>>, vector<8x256xf32>
    %c0_127 = arith.constant 0 : index
    %c0_128 = arith.constant 0 : index
    %c0_129 = arith.constant 0 : index
    %244 = vector.load %arg8[%c0_127, %c0_128, %c0_129] : memref<9x8x8xf32, #tpu.memory_space<vmem>>, vector<1x8x8xf32>
    %245 = vector.shape_cast %244 : vector<1x8x8xf32> to vector<8x8xf32>
    %cst_130 = arith.constant dense<0.000000e+00> : vector<8x256xf32>
    %246 = tpu.matmul %245, %243, %cst_130 {dimension_numbers = #tpu.dot_dimension_numbers<[1], [0], [0], [1], [0, 0, 1, 1], [], []>} : vector<8x8xf32>, vector<8x256xf32>, vector<8x256xf32> -> vector<8x256xf32>
    %c0_131 = arith.constant 0 : index
    %c118_132 = arith.constant 118 : index
    %247 = vector.load %arg12[%c0_131, %c118_132] : memref<8x512xf32, #tpu.memory_space<vmem>>, vector<8x256xf32>
    %c1_133 = arith.constant 1 : index
    %c0_134 = arith.constant 0 : index
    %c0_135 = arith.constant 0 : index
    %248 = vector.load %arg8[%c1_133, %c0_134, %c0_135] : memref<9x8x8xf32, #tpu.memory_space<vmem>>, vector<1x8x8xf32>
    %249 = vector.shape_cast %248 : vector<1x8x8xf32> to vector<8x8xf32>
    %cst_136 = arith.constant dense<0.000000e+00> : vector<8x256xf32>
    %250 = tpu.matmul %249, %247, %cst_136 {dimension_numbers = #tpu.dot_dimension_numbers<[1], [0], [0], [1], [0, 0, 1, 1], [], []>} : vector<8x8xf32>, vector<8x256xf32>, vector<8x256xf32> -> vector<8x256xf32>
    %251 = arith.addf %246, %250 : vector<8x256xf32>
    %c0_137 = arith.constant 0 : index
    %c119_138 = arith.constant 119 : index
    %252 = vector.load %arg12[%c0_137, %c119_138] : memref<8x512xf32, #tpu.memory_space<vmem>>, vector<8x256xf32>
    %c2_139 = arith.constant 2 : index
    %c0_140 = arith.constant 0 : index
    %c0_141 = arith.constant 0 : index
    %253 = vector.load %arg8[%c2_139, %c0_140, %c0_141] : memref<9x8x8xf32, #tpu.memory_space<vmem>>, vector<1x8x8xf32>
    %254 = vector.shape_cast %253 : vector<1x8x8xf32> to vector<8x8xf32>
    %cst_142 = arith.constant dense<0.000000e+00> : vector<8x256xf32>
    %255 = tpu.matmul %254, %252, %cst_142 {dimension_numbers = #tpu.dot_dimension_numbers<[1], [0], [0], [1], [0, 0, 1, 1], [], []>} : vector<8x8xf32>, vector<8x256xf32>, vector<8x256xf32> -> vector<8x256xf32>
    %256 = arith.addf %251, %255 : vector<8x256xf32>
    %c0_143 = arith.constant 0 : index
    %c127_144 = arith.constant 127 : index
    %257 = vector.load %arg12[%c0_143, %c127_144] : memref<8x512xf32, #tpu.memory_space<vmem>>, vector<8x256xf32>
    %c3_145 = arith.constant 3 : index
    %c0_146 = arith.constant 0 : index
    %c0_147 = arith.constant 0 : index
    %258 = vector.load %arg8[%c3_145, %c0_146, %c0_147] : memref<9x8x8xf32, #tpu.memory_space<vmem>>, vector<1x8x8xf32>
    %259 = vector.shape_cast %258 : vector<1x8x8xf32> to vector<8x8xf32>
    %cst_148 = arith.constant dense<0.000000e+00> : vector<8x256xf32>
    %260 = tpu.matmul %259, %257, %cst_148 {dimension_numbers = #tpu.dot_dimension_numbers<[1], [0], [0], [1], [0, 0, 1, 1], [], []>} : vector<8x8xf32>, vector<8x256xf32>, vector<8x256xf32> -> vector<8x256xf32>
    %261 = arith.addf %256, %260 : vector<8x256xf32>
    %c0_149 = arith.constant 0 : index
    %c128_150 = arith.constant 128 : index
    %262 = vector.load %arg12[%c0_149, %c128_150] : memref<8x512xf32, #tpu.memory_space<vmem>>, vector<8x256xf32>
    %c4_151 = arith.constant 4 : index
    %c0_152 = arith.constant 0 : index
    %c0_153 = arith.constant 0 : index
    %263 = vector.load %arg8[%c4_151, %c0_152, %c0_153] : memref<9x8x8xf32, #tpu.memory_space<vmem>>, vector<1x8x8xf32>
    %264 = vector.shape_cast %263 : vector<1x8x8xf32> to vector<8x8xf32>
    %cst_154 = arith.constant dense<0.000000e+00> : vector<8x256xf32>
    %265 = tpu.matmul %264, %262, %cst_154 {dimension_numbers = #tpu.dot_dimension_numbers<[1], [0], [0], [1], [0, 0, 1, 1], [], []>} : vector<8x8xf32>, vector<8x256xf32>, vector<8x256xf32> -> vector<8x256xf32>
    %266 = arith.addf %261, %265 : vector<8x256xf32>
    %c0_155 = arith.constant 0 : index
    %c129_156 = arith.constant 129 : index
    %267 = vector.load %arg12[%c0_155, %c129_156] : memref<8x512xf32, #tpu.memory_space<vmem>>, vector<8x256xf32>
    %c5_157 = arith.constant 5 : index
    %c0_158 = arith.constant 0 : index
    %c0_159 = arith.constant 0 : index
    %268 = vector.load %arg8[%c5_157, %c0_158, %c0_159] : memref<9x8x8xf32, #tpu.memory_space<vmem>>, vector<1x8x8xf32>
    %269 = vector.shape_cast %268 : vector<1x8x8xf32> to vector<8x8xf32>
    %cst_160 = arith.constant dense<0.000000e+00> : vector<8x256xf32>
    %270 = tpu.matmul %269, %267, %cst_160 {dimension_numbers = #tpu.dot_dimension_numbers<[1], [0], [0], [1], [0, 0, 1, 1], [], []>} : vector<8x8xf32>, vector<8x256xf32>, vector<8x256xf32> -> vector<8x256xf32>
    %271 = arith.addf %266, %270 : vector<8x256xf32>
    %c0_161 = arith.constant 0 : index
    %c137_162 = arith.constant 137 : index
    %272 = vector.load %arg12[%c0_161, %c137_162] : memref<8x512xf32, #tpu.memory_space<vmem>>, vector<8x256xf32>
    %c6_163 = arith.constant 6 : index
    %c0_164 = arith.constant 0 : index
    %c0_165 = arith.constant 0 : index
    %273 = vector.load %arg8[%c6_163, %c0_164, %c0_165] : memref<9x8x8xf32, #tpu.memory_space<vmem>>, vector<1x8x8xf32>
    %274 = vector.shape_cast %273 : vector<1x8x8xf32> to vector<8x8xf32>
    %cst_166 = arith.constant dense<0.000000e+00> : vector<8x256xf32>
    %275 = tpu.matmul %274, %272, %cst_166 {dimension_numbers = #tpu.dot_dimension_numbers<[1], [0], [0], [1], [0, 0, 1, 1], [], []>} : vector<8x8xf32>, vector<8x256xf32>, vector<8x256xf32> -> vector<8x256xf32>
    %276 = arith.addf %271, %275 : vector<8x256xf32>
    %c0_167 = arith.constant 0 : index
    %c138_168 = arith.constant 138 : index
    %277 = vector.load %arg12[%c0_167, %c138_168] : memref<8x512xf32, #tpu.memory_space<vmem>>, vector<8x256xf32>
    %c7_169 = arith.constant 7 : index
    %c0_170 = arith.constant 0 : index
    %c0_171 = arith.constant 0 : index
    %278 = vector.load %arg8[%c7_169, %c0_170, %c0_171] : memref<9x8x8xf32, #tpu.memory_space<vmem>>, vector<1x8x8xf32>
    %279 = vector.shape_cast %278 : vector<1x8x8xf32> to vector<8x8xf32>
    %cst_172 = arith.constant dense<0.000000e+00> : vector<8x256xf32>
    %280 = tpu.matmul %279, %277, %cst_172 {dimension_numbers = #tpu.dot_dimension_numbers<[1], [0], [0], [1], [0, 0, 1, 1], [], []>} : vector<8x8xf32>, vector<8x256xf32>, vector<8x256xf32> -> vector<8x256xf32>
    %281 = arith.addf %276, %280 : vector<8x256xf32>
    %c0_173 = arith.constant 0 : index
    %c139_174 = arith.constant 139 : index
    %282 = vector.load %arg12[%c0_173, %c139_174] : memref<8x512xf32, #tpu.memory_space<vmem>>, vector<8x256xf32>
    %c8_175 = arith.constant 8 : index
    %c0_176 = arith.constant 0 : index
    %c0_177 = arith.constant 0 : index
    %283 = vector.load %arg8[%c8_175, %c0_176, %c0_177] : memref<9x8x8xf32, #tpu.memory_space<vmem>>, vector<1x8x8xf32>
    %284 = vector.shape_cast %283 : vector<1x8x8xf32> to vector<8x8xf32>
    %cst_178 = arith.constant dense<0.000000e+00> : vector<8x256xf32>
    %285 = tpu.matmul %284, %282, %cst_178 {dimension_numbers = #tpu.dot_dimension_numbers<[1], [0], [0], [1], [0, 0, 1, 1], [], []>} : vector<8x8xf32>, vector<8x256xf32>, vector<8x256xf32> -> vector<8x256xf32>
    %286 = arith.addf %281, %285 : vector<8x256xf32>
    %c0_179 = arith.constant 0 : index
    %c0_180 = arith.constant 0 : index
    %287 = vector.load %arg9[%c0_179, %c0_180] : memref<8x1xf32, #tpu.memory_space<vmem>>, vector<8x1xf32>
    %c0_181 = arith.constant 0 : index
    %c0_182 = arith.constant 0 : index
    %288 = vector.load %arg10[%c0_181, %c0_182] : memref<8x1xf32, #tpu.memory_space<vmem>>, vector<8x1xf32>
    %289 = vector.extract_strided_slice %286 {offsets = [0, 0], sizes = [8, 128], strides = [1, 1]} : vector<8x256xf32> to vector<8x128xf32>
    %cst_183 = arith.constant 0.000000e+00 : f32
    %290 = vector.shape_cast %2 : vector<1x128xi1> to vector<1x128xi1>
    %291 = vector.broadcast %290 : vector<1x128xi1> to vector<8x128xi1>
    %292 = vector.broadcast %cst_183 : f32 to vector<8x128xf32>
    %293 = arith.select %291, %289, %292 : vector<8x128xi1>, vector<8x128xf32>
    %cst_184 = arith.constant dense<0.000000e+00> : vector<8xf32>
    %294 = vector.multi_reduction <add>, %293, %cst_184 [1] : vector<8x128xf32> to vector<8xf32>
    %295 = vector.shape_cast %294 : vector<8xf32> to vector<8x1xf32>
    %296 = arith.mulf %293, %293 : vector<8x128xf32>
    %cst_185 = arith.constant dense<0.000000e+00> : vector<8xf32>
    %297 = vector.multi_reduction <add>, %296, %cst_185 [1] : vector<8x128xf32> to vector<8xf32>
    %298 = vector.shape_cast %297 : vector<8xf32> to vector<8x1xf32>
    %cst_186 = arith.constant 1.562500e-02 : f32
    %299 = vector.broadcast %cst_186 : f32 to vector<8x1xf32>
    %300 = arith.mulf %295, %299 : vector<8x1xf32>
    %301 = arith.mulf %295, %300 : vector<8x1xf32>
    %302 = arith.subf %298, %301 : vector<8x1xf32>
    %cst_187 = arith.constant 0.0158730168 : f32
    %303 = vector.broadcast %cst_187 : f32 to vector<8x1xf32>
    %304 = arith.mulf %302, %303 : vector<8x1xf32>
    %cst_188 = arith.constant 0.000000e+00 : f32
    %305 = vector.broadcast %cst_188 : f32 to vector<8x1xf32>
    %306 = arith.maximumf %304, %305 : vector<8x1xf32>
    %307 = math.sqrt %306 : vector<8x1xf32>
    %cst_189 = arith.constant 1.000000e-03 : f32
    %308 = vector.broadcast %cst_189 : f32 to vector<8x1xf32>
    %309 = arith.addf %307, %308 : vector<8x1xf32>
    %310 = math.rsqrt %309 : vector<8x1xf32>
    %311 = vector.broadcast %300 : vector<8x1xf32> to vector<8x128xf32>
    %312 = arith.subf %289, %311 : vector<8x128xf32>
    %313 = vector.broadcast %310 : vector<8x1xf32> to vector<8x128xf32>
    %314 = arith.mulf %312, %313 : vector<8x128xf32>
    %315 = vector.broadcast %287 : vector<8x1xf32> to vector<8x128xf32>
    %316 = arith.mulf %315, %314 : vector<8x128xf32>
    %317 = vector.broadcast %288 : vector<8x1xf32> to vector<8x128xf32>
    %318 = arith.addf %316, %317 : vector<8x128xf32>
    %cst_190 = arith.constant 0.000000e+00 : f32
    %319 = vector.broadcast %cst_190 : f32 to vector<8x128xf32>
    %320 = arith.maximumf %318, %319 : vector<8x128xf32>
    %c0_191 = arith.constant 0 : index
    %c0_192 = arith.constant 0 : index
    %c0_193 = arith.constant 0 : index
    %321 = vector.load %arg11[%c0_191, %c0_192, %c0_193] : memref<2x8x128xf32, #tpu.memory_space<vmem>>, vector<1x8x128xf32>
    %322 = vector.shape_cast %321 : vector<1x8x128xf32> to vector<8x128xf32>
    %323 = vector.shape_cast %320 : vector<8x128xf32> to vector<1x8x128xf32>
    tpu.vector_store %arg11[%c0_191, %c0_192, %c0_193], %323 {strides = array<i32>} : memref<2x8x128xf32, #tpu.memory_space<vmem>>, vector<1x8x128xf32>,
    %324 = vector.extract_strided_slice %286 {offsets = [0, 128], sizes = [8, 128], strides = [1, 1]} : vector<8x256xf32> to vector<8x128xf32>
    %cst_194 = arith.constant 0.000000e+00 : f32
    %325 = vector.shape_cast %2 : vector<1x128xi1> to vector<1x128xi1>
    %326 = vector.broadcast %325 : vector<1x128xi1> to vector<8x128xi1>
    %327 = vector.broadcast %cst_194 : f32 to vector<8x128xf32>
    %328 = arith.select %326, %324, %327 : vector<8x128xi1>, vector<8x128xf32>
    %cst_195 = arith.constant dense<0.000000e+00> : vector<8xf32>
    %329 = vector.multi_reduction <add>, %328, %cst_195 [1] : vector<8x128xf32> to vector<8xf32>
    %330 = vector.shape_cast %329 : vector<8xf32> to vector<8x1xf32>
    %331 = arith.mulf %328, %328 : vector<8x128xf32>
    %cst_196 = arith.constant dense<0.000000e+00> : vector<8xf32>
    %332 = vector.multi_reduction <add>, %331, %cst_196 [1] : vector<8x128xf32> to vector<8xf32>
    %333 = vector.shape_cast %332 : vector<8xf32> to vector<8x1xf32>
    %cst_197 = arith.constant 1.562500e-02 : f32
    %334 = vector.broadcast %cst_197 : f32 to vector<8x1xf32>
    %335 = arith.mulf %330, %334 : vector<8x1xf32>
    %336 = arith.mulf %330, %335 : vector<8x1xf32>
    %337 = arith.subf %333, %336 : vector<8x1xf32>
    %cst_198 = arith.constant 0.0158730168 : f32
    %338 = vector.broadcast %cst_198 : f32 to vector<8x1xf32>
    %339 = arith.mulf %337, %338 : vector<8x1xf32>
    %cst_199 = arith.constant 0.000000e+00 : f32
    %340 = vector.broadcast %cst_199 : f32 to vector<8x1xf32>
    %341 = arith.maximumf %339, %340 : vector<8x1xf32>
    %342 = math.sqrt %341 : vector<8x1xf32>
    %cst_200 = arith.constant 1.000000e-03 : f32
    %343 = vector.broadcast %cst_200 : f32 to vector<8x1xf32>
    %344 = arith.addf %342, %343 : vector<8x1xf32>
    %345 = math.rsqrt %344 : vector<8x1xf32>
    %346 = vector.broadcast %335 : vector<8x1xf32> to vector<8x128xf32>
    %347 = arith.subf %324, %346 : vector<8x128xf32>
    %348 = vector.broadcast %345 : vector<8x1xf32> to vector<8x128xf32>
    %349 = arith.mulf %347, %348 : vector<8x128xf32>
    %350 = vector.broadcast %287 : vector<8x1xf32> to vector<8x128xf32>
    %351 = arith.mulf %350, %349 : vector<8x128xf32>
    %352 = vector.broadcast %288 : vector<8x1xf32> to vector<8x128xf32>
    %353 = arith.addf %351, %352 : vector<8x128xf32>
    %cst_201 = arith.constant 0.000000e+00 : f32
    %354 = vector.broadcast %cst_201 : f32 to vector<8x128xf32>
    %355 = arith.maximumf %353, %354 : vector<8x128xf32>
    %c1_202 = arith.constant 1 : index
    %c0_203 = arith.constant 0 : index
    %c0_204 = arith.constant 0 : index
    %356 = vector.load %arg11[%c1_202, %c0_203, %c0_204] : memref<2x8x128xf32, #tpu.memory_space<vmem>>, vector<1x8x128xf32>
    %357 = vector.shape_cast %356 : vector<1x8x128xf32> to vector<8x128xf32>
    %358 = vector.shape_cast %355 : vector<8x128xf32> to vector<1x8x128xf32>
    tpu.vector_store %arg11[%c1_202, %c0_203, %c0_204], %358 {strides = array<i32>} : memref<2x8x128xf32, #tpu.memory_space<vmem>>, vector<1x8x128xf32>,
    return
  }
  func.func @transform_0(%arg0: i32) -> (i32, i32, i32) {
    %c0_i32 = arith.constant 0 : i32
    %c0_i32_0 = arith.constant 0 : i32
    %c0_i32_1 = arith.constant 0 : i32
    return %arg0, %c0_i32, %c0_i32_0 : i32, i32, i32
  }
  func.func @transform_1(%arg0: i32) -> (i32, i32) {
    %c0_i32 = arith.constant 0 : i32
    %c0_i32_0 = arith.constant 0 : i32
    %c0_i32_1 = arith.constant 0 : i32
    return %c0_i32, %c0_i32_0 : i32, i32
  }
  func.func @transform_2(%arg0: i32) -> (i32, i32) {
    %c0_i32 = arith.constant 0 : i32
    %c0_i32_0 = arith.constant 0 : i32
    %c0_i32_1 = arith.constant 0 : i32
    return %c0_i32, %c0_i32_0 : i32, i32
  }
  func.func @transform_3(%arg0: i32) -> (i32, i32) {
    %c0_i32 = arith.constant 0 : i32
    %c0_i32_0 = arith.constant 0 : i32
    %c0_i32_1 = arith.constant 0 : i32
    return %c0_i32, %c0_i32_0 : i32, i32
  }
  func.func @transform_4(%arg0: i32) -> (i32, i32, i32) {
    %c0_i32 = arith.constant 0 : i32
    %c0_i32_0 = arith.constant 0 : i32
    %c0_i32_1 = arith.constant 0 : i32
    %c0_i32_2 = arith.constant 0 : i32
    return %c0_i32, %c0_i32_0, %c0_i32_1 : i32, i32, i32
  }
  func.func @transform_5(%arg0: i32) -> (i32, i32) {
    %c0_i32 = arith.constant 0 : i32
    %c0_i32_0 = arith.constant 0 : i32
    %c0_i32_1 = arith.constant 0 : i32
    return %c0_i32, %c0_i32_0 : i32, i32
  }
  func.func @transform_6(%arg0: i32) -> (i32, i32) {
    %c0_i32 = arith.constant 0 : i32
    %c0_i32_0 = arith.constant 0 : i32
    %c0_i32_1 = arith.constant 0 : i32
    return %c0_i32, %c0_i32_0 : i32, i32
  }
  func.func @transform_7(%arg0: i32) -> (i32, i32, i32) {
    %c0_i32 = arith.constant 0 : i32
    %c0_i32_0 = arith.constant 0 : i32
    %c0_i32_1 = arith.constant 0 : i32
    %c0_i32_2 = arith.constant 0 : i32
    return %c0_i32, %c0_i32_0, %c0_i32_1 : i32, i32, i32
  }
  func.func @transform_8(%arg0: i32) -> (i32, i32) {
    %c0_i32 = arith.constant 0 : i32
    %c0_i32_0 = arith.constant 0 : i32
    %c0_i32_1 = arith.constant 0 : i32
    return %c0_i32, %c0_i32_0 : i32, i32
  }
  func.func @transform_9(%arg0: i32) -> (i32, i32) {
    %c0_i32 = arith.constant 0 : i32
    %c0_i32_0 = arith.constant 0 : i32
    %c0_i32_1 = arith.constant 0 : i32
    return %c0_i32, %c0_i32_0 : i32, i32
  }
  func.func @transform_10(%arg0: i32) -> (i32, i32, i32) {
    %c0_i32 = arith.constant 0 : i32
    %c0_i32_0 = arith.constant 0 : i32
    %c0_i32_1 = arith.constant 0 : i32
    return %arg0, %c0_i32, %c0_i32_0 : i32, i32, i32
  }
}

</mosaic_0001>

<bundles_post_ra>
// kernel: tpu_custom_call.1
= control target key start
LH: loop header
LB: loop body
LE: loop exit
PB: predicated region body
PF: predicated region fallthrough
CT: control target
= control target key end

     0   :  { %s2984_s0 = inlined_call_operand.vmem [shape: f32[2,4,256], index: 0, kind: input, shape index: {}]   ;;  %s2985_s1 = inlined_call_operand.vmem [shape: f32[1,128], index: 1, kind: input, shape index: {}]   ;;  %s2986_s2 = inlined_call_operand.vmem [shape: f32[16,8], index: 2, kind: input, shape index: {}]   ;;  %s2987_s3 = inlined_call_operand.vmem [shape: f32[16,8], index: 3, kind: input, shape index: {}]   ;;  %s2988_s4 = inlined_call_operand.vmem [shape: f32[9,8,4], index: 4, kind: input, shape index: {}]   ;;  %s2989_s5 = inlined_call_operand.vmem [shape: f32[8,1], index: 5, kind: input, shape index: {}]   ;;  %s2990_s6 = inlined_call_operand.vmem [shape: f32[8,1], index: 6, kind: input, shape index: {}]   ;;  %s2991_s7 = inlined_call_operand.vmem [shape: f32[9,8,8], index: 7, kind: input, shape index: {}]   ;;  %s2992_s8 = inlined_call_operand.vmem [shape: f32[8,1], index: 8, kind: input, shape index: {}]   ;;  %s2993_s9 = inlined_call_operand.vmem [shape: f32[8,1], index: 9, kind: input, shape index: {}]   ;;  %s2994_s10 = inlined_call_operand.hbm [shape: f32[2,8,128], index: 10, kind: output, shape index: {}]  }
   0x1   :  { %v2530_v0 = vld [vmem:[%s2984_s0] sm:$0xff] }
   0x2   :  { %15 = vsyncpa [#allocation4], 0  ;;  %s2445_s15 = smov 112   ;;  %v2536_v1 = vld [vmem:[%s2984_s0 + $0x8] sm:$0xff]  ;;  %s2446_s18 = smov 96   ;;  %v2556_v4 = vld [vmem:[%s2986_s2] sm:$0xff] }
   0x3   :  { %48 = vrot.lane.b32.xlu0 %v2530_v0, %s2445_s15  ;;  %v2544_v2 = vld [vmem:[%s2986_s2 + $0x8] sm:$0xff]  ;;  %v2561_v5 = vld [vmem:[%s2987_s3] sm:$0xff]  ;;  %vm52_vm0 = vcmask 130048   ;;  %s2447_s2 = smov 80   ;;  %s2449_s26 = smov 32   ;;  %v280_v37 = vrot.slane %v2530_v0, 4 }
   0x4   :  { %v2549_v3 = vld [vmem:[%s2987_s3 + $0x8] sm:$0xff]  ;;  %70 = vmatpush.msra.mxu0 %v2544_v2  ;;  %123 = vmatpush.msra.mxu2 %v2544_v2  ;;  %s2448_s3 = smov 64   ;;  %s2450_s27 = smov 48   ;;  %v2453_v53 = vmov 0.0   ;;  %v742_v56 = vrot.slane %v2536_v1, 4  ;;  %vm101_vm1 = vcmask 150616  }
   0x5   :  { %90 = vmatpush.msra.mxu1 %v2549_v3  ;;  %149 = vmatpush.msra.mxu3 %v2549_v3  ;;  %s2451_s28 = smov 16   ;;  %s2452_s29 = smov 11   ;;  %38 = vst [vmem:[#allocation2] sm:$0xf] %v2453_v53  ;;  %vm160_vm2 = vcmask 232616   ;;  %vm219_vm3 = vcmask 314616  }
   0x6   :  { %71 = vmatpush.msra.mxu0 %v2556_v4  ;;  %124 = vmatpush.msra.mxu2 %v2556_v4  ;;  %39 = vst [vmem:[#allocation2 + $0x8] sm:$0xf] %v2453_v53  ;;  %s2454_s30 = smov 21   ;;  %s2455_s11 = smov 31   ;;  %vm278_vm4 = vcmask 396616   ;;  %vm333_vm5 = vcmask 478616  }
   0x7   :  { %91 = vmatpush.msra.mxu1 %v2561_v5  ;;  %150 = vmatpush.msra.mxu3 %v2561_v5  ;;  %41 = vst [vmem:[#allocation2 + $0x18] sm:$0xf] %v2453_v53  ;;  %s2456_s12 = smov 51   ;;  %s2457_s13 = smov 71   ;;  %vm392_vm6 = vcmask 560616   ;;  %vm451_vm7 = vcmask 642616  }
   0x8   :  { %241 = vmatpush.msrb.mxu2 %v2544_v2  ;;  %182 = vmatpush.msrb.mxu0 %v2544_v2  ;;  %40 = vst [vmem:[#allocation2 + $0x10] sm:$0xf] %v2453_v53  ;;  %s2458_s14 = smov 41   ;;  %s2460_s16 = smov 81   ;;  %vm510_vm8 = vcmask 724616   ;;  %vm985_vm9 = vcmask 80896  }
   0x9   :  { %267 = vmatpush.msrb.mxu3 %v2549_v3  ;;  %208 = vmatpush.msrb.mxu1 %v2549_v3  ;;  %s2461_s17 = smov 10   ;;  %s2463_s19 = smov 1   ;;  %vm992_vm10 = vcmask 1043456   ;;  %vm988_vm11 = vcmask 31744   ;;  %vm1043_vm12 = vcmask 89088   ;;  %vm1101_vm13 = vcmask 72704  }
   0xa   :  { %242 = vmatpush.msrb.mxu2 %v2556_v4  ;;  %183 = vmatpush.msrb.mxu0 %v2556_v4  ;;  %s2464_s20 = smov 127   ;;  %s2465_s21 = smov 119   ;;  %vm1161_vm14 = vcmask 7168   ;;  %vm1278_vm15 = vcmask 1039360  }
   0xb   :  { %515 = vrot.lane.b32.xlu0 %v2536_v1, %s2445_s15  ;;  %268 = vmatpush.msrb.mxu3 %v2561_v5  ;;  %s2459_s15 = smov 61   ;;  %s2466_s22 = smov 118  }
   0xc   :  { %209 = vmatpush.msrb.mxu1 %v2561_v5  ;;  %s2467_s0 = smov 117  }
  0x13   :  { %335 = vrot.lane.b32.xlu0 %v2530_v0, %s2446_s18 }
  0x75   :  { %v2577_v6 = vpop.permute.xlu0 %48 }
  0x76   :  { %v51_v7 = vmax.f32 %v2530_v0, %v2577_v6  ;;  %v282_v38 = vrot.slane %v2577_v6, 4 }
  0x78   :  { %103 = vst [vmem:[#allocation1] ss:$2 sm:$0xff] %v51_v7  ;;  %2229 = vmatmul.msk.f32.vlgmr.msra.gmra.mxu0 %vm52_vm0, %v51_v7  ;;  %2230 = vmatmul.msk.f32.vlgmr.msra.gmra.mxu1 %vm52_vm0, %v51_v7  ;;  %v284_v39 = vmax.f32 %v280_v37, %v282_v38 }
  0x79   :  { %302 = vmatpush.msra.mxu0 %v2544_v2  ;;  %322 = vmatpush.msra.mxu1 %v2549_v3 }
  0x7b   :  { %303 = vmatpush.msra.mxu0 %v2556_v4  ;;  %323 = vmatpush.msra.mxu1 %v2561_v5 }
  0x7d   :  { %v2599_v13 = vpop.permute.xlu0 %515 }
  0x7e   :  { %v2603_v14 = vmax.f32 %v2536_v1, %v2599_v13  ;;  %v744_v57 = vrot.slane %v2599_v13, 4 }
  0x7f   :  { %v104_v8 = vld.sshfl [vmem:[#allocation1] sm:$0xff pattern:$0x75316420] }
  0x80   :  { %129 = vst [vmem:[#allocation1] ss:$2 sm:$0xff] %v51_v7  ;;  %105 = vrot.lane.b32.xlu1 %v104_v8, %s2446_s18  ;;  %v746_v58 = vmax.f32 %v742_v56, %v744_v57 }
  0x85   :  { %v336_v28 = vpop.permute.xlu0 %335 }
  0x86   :  { %v337_v29 = vrot.slane %v336_v28, 4 }
  0x87   :  { %v130_v9 = vld.sshfl [vmem:[#allocation1] sm:$0xff pattern:$0x75316420] }
  0x88   :  { %131 = vrot.lane.b32.xlu1 %v130_v9, %s2446_s18  ;;  %162 = vst [vmem:[#allocation1] ss:$2 sm:$0xff] %v51_v7 }
  0x8f   :  { %v163_v10 = vld.sshfl [vmem:[#allocation1] sm:$0xff pattern:$0x75316420] }
  0x90   :  { %339 = vrot.lane.b32.xlu1 %v2530_v0, %s2447_s2  ;;  %188 = vst [vmem:[#allocation1] ss:$2 sm:$0xff] %v51_v7 }
  0x97   :  { %v189_v11 = vld.sshfl [vmem:[#allocation1] sm:$0xff pattern:$0x75316420] }
  0x98   :  { %190 = vrot.lane.b32.xlu0 %v189_v11, %s2448_s3  ;;  %221 = vst [vmem:[#allocation1] ss:$2 sm:$0xff] %v51_v7  ;;  %453 = vrot.lane.b32.xlu1 %v2530_v0, %s2449_s26 }
  0x9f   :  { %v222_v12 = vld.sshfl [vmem:[#allocation1] sm:$0xff pattern:$0x75316420] }
  0xa0   :  { %223 = vrot.lane.b32.xlu2 %v222_v12, %s2449_s26  ;;  %247 = vst [vmem:[#allocation1] ss:$2 sm:$0xff] %v51_v7  ;;  %398 = vrot.lane.b32.xlu1 %v2530_v0, %s2450_s27 }
  0xa1   :  { %394 = vrot.lane.b32.xlu0 %v2530_v0, %s2448_s3 }
  0xa7   :  { %v248_v15 = vld.sshfl [vmem:[#allocation1] sm:$0xff pattern:$0x75316420] }
  0xa8   :  { %249 = vrot.lane.b32.xlu2 %v248_v15, %s2449_s26  ;;  %568 = vst [vmem:[#allocation1] ss:$2 sm:$0xff] %v2603_v14 }
  0xaf   :  { %v569_v16 = vld.sshfl [vmem:[#allocation1] sm:$0xff pattern:$0x75316420] }
  0xb0   :  { %594 = vst [vmem:[#allocation1] ss:$2 sm:$0xff] %v2603_v14  ;;  %164 = vrot.lane.b32.xlu2 %v163_v10, %s2448_s3 }
  0xb7   :  { %v595_v17 = vld.sshfl [vmem:[#allocation1] sm:$0xff pattern:$0x75316420] }
  0xb8   :  { %457 = vrot.lane.b32.xlu2 %v2530_v0, %s2451_s28  ;;  %596 = vrot.lane.b32.xlu0 %v595_v17, %s2446_s18  ;;  %626 = vst [vmem:[#allocation1] ss:$2 sm:$0xff] %v2603_v14 }
  0xbf   :  { %v627_v18 = vld.sshfl [vmem:[#allocation1] sm:$0xff pattern:$0x75316420] }
  0xc0   :  { %652 = vst [vmem:[#allocation1] ss:$2 sm:$0xff] %v2603_v14  ;;  %570 = vrot.lane.b32.xlu2 %v569_v16, %s2446_s18  ;;  %796 = vrot.lane.b32.xlu0 %v2536_v1, %s2446_s18  ;;  %s2462_s18 = smov 9  }
  0xc7   :  { %v653_v19 = vld.sshfl [vmem:[#allocation1] sm:$0xff pattern:$0x75316420] }
  0xc8   :  { %654 = vrot.lane.b32.xlu0 %v653_v19, %s2448_s3  ;;  %684 = vst [vmem:[#allocation1] ss:$2 sm:$0xff] %v2603_v14 }
  0xcf   :  { %v685_v20 = vld.sshfl [vmem:[#allocation1] sm:$0xff pattern:$0x75316420] }
  0xd0   :  { %686 = vrot.lane.b32.xlu1 %v685_v20, %s2449_s26  ;;  %710 = vst [vmem:[#allocation1] ss:$2 sm:$0xff] %v2603_v14  ;;  %854 = vrot.lane.b32.xlu0 %v2536_v1, %s2448_s3 }
  0xd7   :  { %v711_v21 = vld.sshfl [vmem:[#allocation1] sm:$0xff pattern:$0x75316420] }
  0xd8   :  { %800 = vrot.lane.b32.xlu1 %v2536_v1, %s2447_s2  ;;  %712 = vrot.lane.b32.xlu2 %v711_v21, %s2449_s26 }
  0xe0   :  { %912 = vrot.lane.b32.xlu1 %v2536_v1, %s2449_s26  ;;  %628 = vrot.lane.b32.xlu2 %v627_v18, %s2448_s3  ;;  %s2470_s3 = smov 128   ;;  %s2471_s26 = smov 8  }
  0xe8   :  { %858 = vrot.lane.b32.xlu1 %v2536_v1, %s2450_s27  ;;  %916 = vrot.lane.b32.xlu2 %v2536_v1, %s2451_s28 }
  0xf2   :  { %v106_v22 = vpop.permute.xlu1 %105 }
  0xf3   :  { %2231 = vmatmul.msk.f32.vlgmr.msra.gmra.mxu2 %vm52_vm0, %v106_v22 }
  0xf4   :  { %361 = vmatpush.msra.mxu2 %v2544_v2 }
  0xf5   :  { %v73_v23 = vpop.f32.mrf.mxu0  ;;  %v93_v24 = vpop.f32.mrf.mxu1 }
  0xf6   :  { %v96_v25 = vmax.f32 %v73_v23, %v93_v24  ;;  %362 = vmatpush.msra.mxu2 %v2556_v4 }
  0xf8   :  { %98 = vrot.lane.b32.xlu2 %v96_v25, %s2452_s29 }
  0xfa   :  { %v132_v26 = vpop.permute.xlu1 %131  ;;  %v224_v27 = vpop.permute.xlu2 %223 }
  0xfb   :  { %2232 = vmatmul.msk.f32.vlgmr.msra.gmra.mxu3 %vm52_vm0, %v132_v26  ;;  %2235 = vmatmul.msk.f32.vlgmr.msrb.gmra.mxu2 %vm52_vm0, %v224_v27 }
  0xfc   :  { %479 = vmatpush.msrb.mxu2 %v2544_v2  ;;  %381 = vmatpush.msra.mxu3 %v2549_v3 }
  0xfe   :  { %480 = vmatpush.msrb.mxu2 %v2556_v4  ;;  %382 = vmatpush.msra.mxu3 %v2561_v5 }
 0x102   :  { %v250_v30 = vpop.permute.xlu2 %249  ;;  %v340_v31 = vpop.permute.xlu1 %339 }
 0x103   :  { %2236 = vmatmul.msk.f32.vlgmr.msrb.gmra.mxu3 %vm52_vm0, %v250_v30  ;;  %v341_v32 = vrot.slane %v340_v31, 4 }
 0x104   :  { %499 = vmatpush.msrb.mxu3 %v2549_v3 }
 0x105   :  { %v343_v33 = vmax.f32 %v337_v29, %v341_v32 }
 0x106   :  { %500 = vmatpush.msrb.mxu3 %v2561_v5 }
 0x107   :  { %2239 = vmatmul.msk.f32.vlgmr.msra.gmra.mxu2 %vm52_vm0, %v343_v33 }
 0x108   :  { %588 = vmatpush.msra.mxu2 %v2544_v2 }
 0x10a   :  { %v165_v34 = vpop.permute.xlu2 %164  ;;  %v191_v35 = vpop.permute.xlu0 %190  ;;  %589 = vmatpush.msra.mxu2 %v2556_v4 }
 0x10b   :  { %2233 = vmatmul.msk.f32.vlgmr.msrb.gmra.mxu0 %vm52_vm0, %v165_v34  ;;  %2234 = vmatmul.msk.f32.vlgmr.msrb.gmra.mxu1 %vm52_vm0, %v191_v35  ;;  %v454_v36 = vpop.permute.xlu1 %453 }
 0x10c   :  { %420 = vmatpush.msrb.mxu0 %v2544_v2  ;;  %440 = vmatpush.msrb.mxu1 %v2549_v3  ;;  %v455_v40 = vrot.slane %v454_v36, 4 }
 0x10d   :  { %2240 = vmatmul.msk.f32.vlgmr.msra.gmra.mxu3 %vm52_vm0, %v343_v33 }
 0x10e   :  { %421 = vmatpush.msrb.mxu0 %v2556_v4  ;;  %441 = vmatpush.msrb.mxu1 %v2561_v5 }
 0x10f   :  { %614 = vmatpush.msra.mxu3 %v2549_v3 }
 0x111   :  { %615 = vmatpush.msra.mxu3 %v2561_v5 }
 0x112   :  { %v458_v41 = vpop.permute.xlu2 %457 }
 0x113   :  { %v459_v42 = vrot.slane %v458_v41, 4  ;;  %2237 = vmatmul.msk.f32.vlgmr.msra.gmra.mxu0 %vm52_vm0, %v284_v39  ;;  %2238 = vmatmul.msk.f32.vlgmr.msra.gmra.mxu1 %vm52_vm0, %v284_v39  ;;  %v399_v43 = vpop.permute.xlu1 %398  ;;  %v395_v44 = vpop.permute.xlu0 %394 }
 0x114   :  { %v400_v45 = vrot.slane %v399_v43, 4  ;;  %v396_v46 = vrot.slane %v395_v44, 4  ;;  %536 = vmatpush.msra.mxu0 %v2544_v2  ;;  %556 = vmatpush.msra.mxu1 %v2549_v3 }
 0x115   :  { %v461_v47 = vmax.f32 %v455_v40, %v459_v42 }
 0x116   :  { %537 = vmatpush.msra.mxu0 %v2556_v4  ;;  %557 = vmatpush.msra.mxu1 %v2561_v5  ;;  %v402_v48 = vmax.f32 %v396_v46, %v400_v45 }
 0x117   :  { %2243 = vmatmul.msk.f32.vlgmr.msrb.gmra.mxu2 %vm52_vm0, %v461_v47  ;;  %2244 = vmatmul.msk.f32.vlgmr.msrb.gmra.mxu3 %vm52_vm0, %v461_v47 }
 0x118   :  { %730 = vmatpush.msrb.mxu3 %v2549_v3  ;;  %704 = vmatpush.msrb.mxu2 %v2544_v2 }
 0x11a   :  { %731 = vmatpush.msrb.mxu3 %v2561_v5  ;;  %705 = vmatpush.msrb.mxu2 %v2556_v4  ;;  %v571_v49 = vpop.permute.xlu2 %570 }
 0x11b   :  { %2241 = vmatmul.msk.f32.vlgmr.msrb.gmra.mxu0 %vm52_vm0, %v402_v48  ;;  %2242 = vmatmul.msk.f32.vlgmr.msrb.gmra.mxu1 %vm52_vm0, %v402_v48 }
 0x11c   :  { %646 = vmatpush.msrb.mxu0 %v2544_v2  ;;  %672 = vmatpush.msrb.mxu1 %v2549_v3 }
 0x11e   :  { %647 = vmatpush.msrb.mxu0 %v2556_v4  ;;  %673 = vmatpush.msrb.mxu1 %v2561_v5 }
 0x11f   :  { %2248 = vmatmul.msk.f32.vlgmr.msra.gmra.mxu2 %vm52_vm0, %v571_v49 }
 0x120   :  { %822 = vmatpush.msra.mxu2 %v2544_v2 }
 0x122   :  { %823 = vmatpush.msra.mxu2 %v2556_v4 }
 0x123   :  { %2246 = vmatmul.msk.f32.vlgmr.msra.gmra.mxu0 %vm52_vm0, %v2603_v14  ;;  %2247 = vmatmul.msk.f32.vlgmr.msra.gmra.mxu1 %vm52_vm0, %v2603_v14 }
 0x124   :  { %764 = vmatpush.msra.mxu0 %v2544_v2  ;;  %784 = vmatpush.msra.mxu1 %v2549_v3 }
 0x126   :  { %765 = vmatpush.msra.mxu0 %v2556_v4  ;;  %785 = vmatpush.msra.mxu1 %v2561_v5 }
 0x12a   :  { %v597_v50 = vpop.permute.xlu0 %596 }
 0x12b   :  { %2249 = vmatmul.msk.f32.vlgmr.msra.gmra.mxu3 %vm52_vm0, %v597_v50 }
 0x12c   :  { %842 = vmatpush.msra.mxu3 %v2549_v3 }
 0x12e   :  { %843 = vmatpush.msra.mxu3 %v2561_v5 }
 0x132   :  { %v713_v51 = vpop.permute.xlu2 %712  ;;  %v797_v52 = vpop.permute.xlu0 %796 }
 0x133   :  { %2253 = vmatmul.msk.f32.vlgmr.msrb.gmra.mxu3 %vm52_vm0, %v713_v51  ;;  %v798_v62 = vrot.slane %v797_v52, 4 }
 0x134   :  { %958 = vmatpush.msrb.mxu3 %v2549_v3 }
 0x136   :  { %959 = vmatpush.msrb.mxu3 %v2561_v5 }
 0x13a   :  { %v629_v54 = vpop.permute.xlu2 %628  ;;  %v655_v55 = vpop.permute.xlu0 %654 }
 0x13b   :  { %2250 = vmatmul.msk.f32.vlgmr.msrb.gmra.mxu0 %vm52_vm0, %v629_v54  ;;  %2251 = vmatmul.msk.f32.vlgmr.msrb.gmra.mxu1 %vm52_vm0, %v655_v55 }
 0x13c   :  { %880 = vmatpush.msrb.mxu0 %v2544_v2  ;;  %900 = vmatpush.msrb.mxu1 %v2549_v3 }
 0x13e   :  { %881 = vmatpush.msrb.mxu0 %v2556_v4  ;;  %901 = vmatpush.msrb.mxu1 %v2561_v5 }
 0x142   :  { %v687_v59 = vpop.permute.xlu1 %686  ;;  %v917_v60 = vpop.permute.xlu2 %916 }
 0x143   :  { %2252 = vmatmul.msk.f32.vlgmr.msrb.gmra.mxu2 %vm52_vm0, %v687_v59  ;;  %2254 = vmatmul.msk.f32.vlgmr.msra.gmra.mxu0 %vm52_vm0, %v746_v58  ;;  %v918_v1 = vrot.slane %v917_v60, 4 }
 0x144   :  { %2255 = vmatmul.msk.f32.vlgmr.msra.gmra.mxu1 %vm52_vm0, %v746_v58  ;;  %938 = vmatpush.msrb.mxu2 %v2544_v2  ;;  %v855_v2 = vpop.permute.xlu0 %854 }
 0x146   :  { %939 = vmatpush.msrb.mxu2 %v2556_v4  ;;  %v856_v4 = vrot.slane %v855_v2, 4 }
 0x14a   :  { %v801_v61 = vpop.permute.xlu1 %800 }
 0x14b   :  { %v802_v63 = vrot.slane %v801_v61, 4  ;;  %v970_v61 = vld [vmem:[#allocation2] sm:$0xf] }
 0x14d   :  { %v804_v0 = vmax.f32 %v798_v62, %v802_v63 }
 0x14f   :  { %2256 = vmatmul.msk.f32.vlgmr.msra.gmra.mxu2 %vm52_vm0, %v804_v0  ;;  %2257 = vmatmul.msk.f32.vlgmr.msra.gmra.mxu3 %vm52_vm0, %v804_v0 }
 0x152   :  { %v913_v3 = vpop.permute.xlu1 %912  ;;  %v99_v5 = vpop.permute.xlu2 %98 }
 0x153   :  { %v914_v6 = vrot.slane %v913_v3, 4  ;;  %102 = vst.msk [vmem:[#allocation2 + $0x8] sm:$0xf] %vm101_vm1, %v99_v5  ;;  %v1266_v3 = vld [vmem:[#allocation2 + $0x18] sm:$0xf] }
 0x155   :  { %v920_v7 = vmax.f32 %v914_v6, %v918_v1 }
 0x157   :  { %2260 = vmatmul.msk.f32.vlgmr.msrb.gmra.mxu2 %vm52_vm0, %v920_v7  ;;  %2261 = vmatmul.msk.f32.vlgmr.msrb.gmra.mxu3 %vm52_vm0, %v920_v7 }
 0x15a   :  { %v859_v8 = vpop.permute.xlu1 %858 }
 0x15b   :  { %v860_v9 = vrot.slane %v859_v8, 4 }
 0x15d   :  { %v862_v10 = vmax.f32 %v856_v4, %v860_v9 }
 0x15f   :  { %2258 = vmatmul.msk.f32.vlgmr.msrb.gmra.mxu0 %vm52_vm0, %v862_v10  ;;  %2259 = vmatmul.msk.f32.vlgmr.msrb.gmra.mxu1 %vm52_vm0, %v862_v10  ;;  %vm1338_vm0 = vcmask 973824  }
 0x176   :  { %v126_v11 = vpop.f32.mrf.mxu2 }
 0x17e   :  { %v152_v12 = vpop.f32.mrf.mxu3  ;;  %v244_v20 = vpop.f32.mrf.mxu2 }
 0x17f   :  { %v155_v13 = vmax.f32 %v126_v11, %v152_v12 }
 0x181   :  { %157 = vrot.lane.b32.xlu1 %v155_v13, %s2454_s30 }
 0x186   :  { %v270_v21 = vpop.f32.mrf.mxu3 }
 0x187   :  { %v273_v29 = vmax.f32 %v244_v20, %v270_v21 }
 0x188   :  { %v185_v14 = vpop.f32.mrf.mxu0  ;;  %v211_v15 = vpop.f32.mrf.mxu1 }
 0x189   :  { %v214_v16 = vmax.f32 %v185_v14, %v211_v15 }
 0x18a   :  { %v364_v25 = vpop.f32.mrf.mxu2 }
 0x18b   :  { %216 = vrot.lane.b32.xlu0 %v214_v16, %s2455_s11 }
 0x190   :  { %v305_v17 = vpop.f32.mrf.mxu0  ;;  %v325_v18 = vpop.f32.mrf.mxu1 }
 0x191   :  { %v328_v19 = vmax.f32 %v305_v17, %v325_v18  ;;  %v384_v26 = vpop.f32.mrf.mxu3  ;;  %v2262_v18 = vld [vmem:[%s2988_s4 + $0x8] sm:$0xff] }
 0x192   :  { %v387_v33 = vmax.f32 %v364_v25, %v384_v26 }
 0x193   :  { %330 = vrot.lane.b32.xlu1 %v328_v19, %s2456_s12 }
 0x198   :  { %v423_v22 = vpop.f32.mrf.mxu0  ;;  %v443_v23 = vpop.f32.mrf.mxu1 }
 0x199   :  { %v446_v24 = vmax.f32 %v423_v22, %v443_v23 }
 0x19a   :  { %v482_v31 = vpop.f32.mrf.mxu2  ;;  %v502_v32 = vpop.f32.mrf.mxu3 }
 0x19b   :  { %448 = vrot.lane.b32.xlu2 %v446_v24, %s2457_s13  ;;  %v505_v51 = vmax.f32 %v482_v31, %v502_v32  ;;  %v973_v24 = vld [vmem:[%s2988_s4] sm:$0xff]  ;;  %v2271_v32 = vld [vmem:[%s2988_s4 + $0x10] sm:$0xff] }
 0x1a0   :  { %v539_v27 = vpop.f32.mrf.mxu0  ;;  %v559_v28 = vpop.f32.mrf.mxu1 }
 0x1a1   :  { %v562_v30 = vmax.f32 %v539_v27, %v559_v28 }
 0x1a2   :  { %v591_v34 = vpop.f32.mrf.mxu2 }
 0x1a3   :  { %564 = vrot.lane.b32.xlu0 %v562_v30, %s2452_s29  ;;  %275 = vrot.lane.b32.xlu2 %v273_v29, %s2458_s14 }
 0x1ab   :  { %389 = vrot.lane.b32.xlu0 %v387_v33, %s2459_s15 }
 0x1ae   :  { %v617_v35 = vpop.f32.mrf.mxu3 }
 0x1af   :  { %v620_v36 = vmax.f32 %v591_v34, %v617_v35  ;;  %v2276_v35 = vld [vmem:[%s2988_s4 + $0x18] sm:$0xff] }
 0x1b1   :  { %622 = vrot.lane.b32.xlu2 %v620_v36, %s2454_s30 }
 0x1b6   :  { %v733_v43 = vpop.f32.mrf.mxu3 }
 0x1b8   :  { %v649_v37 = vpop.f32.mrf.mxu0  ;;  %v675_v38 = vpop.f32.mrf.mxu1 }
 0x1b9   :  { %v678_v39 = vmax.f32 %v649_v37, %v675_v38  ;;  %v2281_v38 = vld [vmem:[%s2988_s4 + $0x20] sm:$0xff] }
 0x1bb   :  { %680 = vrot.lane.b32.xlu1 %v678_v39, %s2455_s11 }
 0x1c0   :  { %v767_v40 = vpop.f32.mrf.mxu0 }
 0x1c1   :  { %v787_v41 = vpop.f32.mrf.mxu1 }
 0x1c2   :  { %v790_v42 = vmax.f32 %v767_v40, %v787_v41  ;;  %v2286_v41 = vld [vmem:[%s2988_s4 + $0x28] sm:$0xff] }
 0x1c4   :  { %792 = vrot.lane.b32.xlu2 %v790_v42, %s2456_s12 }
 0x1c6   :  { %v707_v44 = vpop.f32.mrf.mxu2 }
 0x1c7   :  { %v736_v45 = vmax.f32 %v707_v44, %v733_v43 }
 0x1c9   :  { %738 = vrot.lane.b32.xlu0 %v736_v45, %s2458_s14 }
 0x1d2   :  { %v825_v46 = vpop.f32.mrf.mxu2  ;;  %v845_v47 = vpop.f32.mrf.mxu3 }
 0x1d3   :  { %v848_v48 = vmax.f32 %v825_v46, %v845_v47  ;;  %v2291_v47 = vld [vmem:[%s2988_s4 + $0x30] sm:$0xff] }
 0x1d5   :  { %850 = vrot.lane.b32.xlu1 %v848_v48, %s2459_s15 }
 0x1da   :  { %v941_v49 = vpop.f32.mrf.mxu2  ;;  %v961_v50 = vpop.f32.mrf.mxu3 }
 0x1db   :  { %v964_v52 = vmax.f32 %v941_v49, %v961_v50 }
 0x1dc   :  { %v883_v53 = vpop.f32.mrf.mxu0  ;;  %v903_v54 = vpop.f32.mrf.mxu1 }
 0x1dd   :  { %v906_v55 = vmax.f32 %v883_v53, %v903_v54  ;;  %507 = vrot.lane.b32.xlu1 %v505_v51, %s2460_s16  ;;  %966 = vrot.lane.b32.xlu2 %v964_v52, %s2460_s16  ;;  %v2296_v53 = vld [vmem:[%s2988_s4 + $0x38] sm:$0xff] }
 0x1df   :  { %908 = vrot.lane.b32.xlu0 %v906_v55, %s2457_s13 }
 0x1e5   :  { %1276 = vrot.lane.b32.xlu2 %v1266_v3, %s2464_s20 }
 0x1e7   :  { %979 = vrot.lane.b32.xlu0 %v970_v61, %s2461_s17 }
 0x1ef   :  { %1037 = vrot.lane.b32.xlu0 %v970_v61, %s2452_s29 }
 0x1f3   :  { %v158_v56 = vpop.permute.xlu1 %157 }
 0x1f4   :  { %161 = vst.msk [vmem:[#allocation2 + $0x8] sm:$0xf] %vm160_vm2, %v158_v56 }
 0x1f5   :  { %v449_v57 = vpop.permute.xlu2 %448 }
 0x1f7   :  { %1095 = vrot.lane.b32.xlu0 %v970_v61, %s2462_s18 }
 0x1fd   :  { %v217_v58 = vpop.permute.xlu0 %216  ;;  %v276_v59 = vpop.permute.xlu2 %275 }
 0x1fe   :  { %220 = vst.msk [vmem:[#allocation2 + $0x8] sm:$0xf] %vm219_vm3, %v217_v58 }
 0x1ff   :  { %279 = vst.msk [vmem:[#allocation2 + $0x8] sm:$0xf] %vm278_vm4, %v276_v59  ;;  %1155 = vrot.lane.b32.xlu0 %v970_v61, %s2463_s19  ;;  %v2301_v59 = vld [vmem:[%s2988_s4 + $0x40] sm:$0xff] }
 0x205   :  { %v331_v60 = vpop.permute.xlu1 %330 }
 0x206   :  { %334 = vst.msk [vmem:[#allocation2 + $0x8] sm:$0xf] %vm333_vm5, %v331_v60 }
 0x20b   :  { %v623_v63 = vpop.permute.xlu2 %622 }
 0x215   :  { %v565_v62 = vpop.permute.xlu0 %564 }
 0x216   :  { %567 = vst.msk [vmem:[#allocation2 + $0x10] sm:$0xf] %vm101_vm1, %v565_v62  ;;  %vm1398_vm1 = vcmask 965632  }
 0x217   :  { %625 = vst.msk [vmem:[#allocation2 + $0x10] sm:$0xf] %vm160_vm2, %v623_v63  ;;  %vm1458_vm2 = vcmask 957440  }
 0x21d   :  { %v390_v0 = vpop.permute.xlu0 %389 }
 0x21e   :  { %393 = vst.msk [vmem:[#allocation2 + $0x8] sm:$0xf] %vm392_vm6, %v390_v0  ;;  %v793_v6 = vpop.permute.xlu2 %792  ;;  %v2468_v0 = vmov 0  }
 0x21f   :  { %452 = vst.msk [vmem:[#allocation2 + $0x8] sm:$0xf] %vm451_vm7, %v449_v57  ;;  %2359 = vset.pattern.permute.xlu0 %v2468_v0  ;;  %2360 = vset.pattern.permute.xlu1 %v2468_v0 }
 0x22d   :  { %v681_v1 = vpop.permute.xlu1 %680 }
 0x22e   :  { %683 = vst.msk [vmem:[#allocation2 + $0x10] sm:$0xf] %vm219_vm3, %v681_v1 }
 0x237   :  { %v967_v4 = vpop.permute.xlu2 %966 }
 0x23b   :  { %v739_v5 = vpop.permute.xlu0 %738 }
 0x23c   :  { %741 = vst.msk [vmem:[#allocation2 + $0x10] sm:$0xf] %vm278_vm4, %v739_v5 }
 0x23d   :  { %795 = vst.msk [vmem:[#allocation2 + $0x10] sm:$0xf] %vm333_vm5, %v793_v6 }
 0x23f   :  { %v1277_v13 = vpop.permute.xlu2 %1276 }
 0x247   :  { %v851_v7 = vpop.permute.xlu1 %850 }
 0x248   :  { %853 = vst.msk [vmem:[#allocation2 + $0x10] sm:$0xf] %vm392_vm6, %v851_v7 }
 0x24f   :  { %v508_v2 = vpop.permute.xlu1 %507 }
 0x250   :  { %511 = vst.msk [vmem:[#allocation2 + $0x8] sm:$0xf] %vm510_vm8, %v508_v2 }
 0x251   :  { %v909_v8 = vpop.permute.xlu0 %908 }
 0x252   :  { %911 = vst.msk [vmem:[#allocation2 + $0x10] sm:$0xf] %vm451_vm7, %v909_v8 }
 0x253   :  { %969 = vst.msk [vmem:[#allocation2 + $0x10] sm:$0xf] %vm510_vm8, %v967_v4 }
 0x257   :  { %v971_v9 = vld [vmem:[#allocation2 + $0x8] sm:$0xf] }
 0x258   :  { %v1264_v10 = vld [vmem:[#allocation2 + $0x8] sm:$0xf]  ;;  %981 = vrot.lane.b32.xlu1 %v971_v9, %s2461_s17 }
 0x259   :  { %1272 = vrot.lane.b32.xlu0 %v1264_v10, %s2464_s20  ;;  %v980_v14 = vpop.permute.xlu0 %979 }
 0x25a   :  { %v972_v11 = vld [vmem:[#allocation2 + $0x10] sm:$0xf] }
 0x25b   :  { %983 = vrot.lane.b32.xlu2 %v972_v11, %s2461_s17  ;;  %v1265_v12 = vld [vmem:[#allocation2 + $0x10] sm:$0xf] }
 0x260   :  { %1039 = vrot.lane.b32.xlu1 %v971_v9, %s2452_s29 }
 0x261   :  { %1332 = vrot.lane.b32.xlu0 %v1264_v10, %s2465_s21  ;;  %v1038_v16 = vpop.permute.xlu0 %1037 }
 0x263   :  { %1041 = vrot.lane.b32.xlu2 %v972_v11, %s2452_s29 }
 0x268   :  { %1097 = vrot.lane.b32.xlu1 %v971_v9, %s2462_s18 }
 0x269   :  { %1392 = vrot.lane.b32.xlu0 %v1264_v10, %s2466_s22  ;;  %v1096_v22 = vpop.permute.xlu0 %1095 }
 0x26b   :  { %1099 = vrot.lane.b32.xlu2 %v972_v11, %s2462_s18 }
 0x270   :  { %1157 = vrot.lane.b32.xlu1 %v971_v9, %s2463_s19 }
 0x271   :  { %1452 = vrot.lane.b32.xlu0 %v1264_v10, %s2467_s0  ;;  %v1156_v28 = vpop.permute.xlu0 %1155 }
 0x273   :  { %1159 = vrot.lane.b32.xlu2 %v972_v11, %s2463_s19 }
 0x278   :  { %1274 = vrot.lane.b32.xlu1 %v1265_v12, %s2464_s20 }
 0x27b   :  { %1336 = vrot.lane.b32.xlu2 %v1266_v3, %s2465_s21 }
 0x280   :  { %1334 = vrot.lane.b32.xlu1 %v1265_v12, %s2465_s21 }
 0x283   :  { %1396 = vrot.lane.b32.xlu2 %v1266_v3, %s2466_s22 }
 0x288   :  { %1394 = vrot.lane.b32.xlu1 %v1265_v12, %s2466_s22 }
 0x28b   :  { %1456 = vrot.lane.b32.xlu2 %v1266_v3, %s2467_s0 }
 0x290   :  { %1454 = vrot.lane.b32.xlu1 %v1265_v12, %s2467_s0 }
 0x2b5   :  { %v984_v15 = vpop.permute.xlu2 %983 }
 0x2bd   :  { %v1042_v21 = vpop.permute.xlu2 %1041 }
 0x2c5   :  { %v1100_v27 = vpop.permute.xlu2 %1099 }
 0x2ca   :  { %v982_v17 = vpop.permute.xlu1 %981 }
 0x2cb   :  { %v986_v19 = vsel %vm985_vm9, %v980_v14, %v982_v17  ;;  %v987_v20 = vsel %vm985_vm9, %v982_v17, %v984_v15  ;;  %v1273_v39 = vpop.permute.xlu0 %1272  ;;  %v36_v15 = vld [vmem:[%s2985_s1] sm:$0x1]  ;;  %s2217_s1 = sshll.u32 %s2994_s10, 4  ;;  %s2218_s1 = int_to_ptr.hbm [resolvable:$true] %s2217_s1 }
 0x2cc   :  { %2263 = vmatpush.msk.msra.mxu0 %vm992_vm10, %v986_v19  ;;  %2265 = vmatpush.msk.msra.mxu1 %vm992_vm10, %v987_v20  ;;  %vm37_vm3 = vcmp.ne.f32.partialorder %v36_v15, 0.0 }
 0x2cd   :  { %2264 = vmatmul.msk.f32.vlgmr.msra.gmra.mxu0 %vm988_vm11, %v2262_v18  ;;  %2266 = vmatmul.msk.f32.vlgmr.msra.gmra.mxu1 %vm988_vm11, %v2262_v18  ;;  %v1160_v33 = vpop.permute.xlu2 %1159 }
 0x2d2   :  { %v1040_v23 = vpop.permute.xlu1 %1039 }
 0x2d3   :  { %v1044_v25 = vsel %vm1043_vm12, %v1038_v16, %v1040_v23  ;;  %v1045_v26 = vsel %vm1043_vm12, %v1040_v23, %v1042_v21  ;;  %v1333_v45 = vpop.permute.xlu0 %1332 }
 0x2d4   :  { %2267 = vmatpush.msk.msra.mxu2 %vm992_vm10, %v1044_v25  ;;  %2269 = vmatpush.msk.msra.mxu3 %vm992_vm10, %v1045_v26 }
 0x2d5   :  { %2268 = vmatmul.msk.f32.vlgmr.msra.gmra.mxu2 %vm988_vm11, %v973_v24  ;;  %2270 = vmatmul.msk.f32.vlgmr.msra.gmra.mxu3 %vm988_vm11, %v973_v24  ;;  %v1337_v44 = vpop.permute.xlu2 %1336  ;;  %v1512_v24 = vsel %vm37_vm3, 1, %v2468_v0 }
 0x2d6   :  { %v1513_v25 = vperm.slane %v1512_v24, 0 }
 0x2d8   :  { %vm2841_vm4 = vcmp.eq.s32.totalorder %v1513_v25, 1 }
 0x2da   :  { %v1098_v29 = vpop.permute.xlu1 %1097 }
 0x2db   :  { %v1102_v30 = vsel %vm1101_vm13, %v1096_v22, %v1098_v29  ;;  %v1103_v31 = vsel %vm1101_vm13, %v1098_v29, %v1100_v27  ;;  %v1393_v51 = vpop.permute.xlu0 %1392 }
 0x2dc   :  { %2272 = vmatpush.msk.msrb.mxu0 %vm992_vm10, %v1102_v30  ;;  %2274 = vmatpush.msk.msrb.mxu1 %vm992_vm10, %v1103_v31 }
 0x2dd   :  { %2273 = vmatmul.msk.f32.vlgmr.msrb.gmra.mxu0 %vm988_vm11, %v2271_v32  ;;  %2275 = vmatmul.msk.f32.vlgmr.msrb.gmra.mxu1 %vm988_vm11, %v2271_v32  ;;  %v1397_v50 = vpop.permute.xlu2 %1396 }
 0x2de   :  { %2282 = vmatpush.msk.msra.mxu0 %vm992_vm10, %v971_v9  ;;  %2284 = vmatpush.msk.msra.mxu1 %vm992_vm10, %v972_v11 }
 0x2e2   :  { %v1158_v34 = vpop.permute.xlu1 %1157 }
 0x2e3   :  { %v1162_v36 = vsel %vm1161_vm14, %v1156_v28, %v1158_v34  ;;  %v1163_v37 = vsel %vm1161_vm14, %v1158_v34, %v1160_v33  ;;  %v1453_v57 = vpop.permute.xlu0 %1452 }
 0x2e4   :  { %2277 = vmatpush.msk.msrb.mxu2 %vm992_vm10, %v1162_v36  ;;  %2279 = vmatpush.msk.msrb.mxu3 %vm992_vm10, %v1163_v37 }
 0x2e5   :  { %2278 = vmatmul.msk.f32.vlgmr.msrb.gmra.mxu2 %vm988_vm11, %v2276_v35  ;;  %2280 = vmatmul.msk.f32.vlgmr.msrb.gmra.mxu3 %vm988_vm11, %v2276_v35  ;;  %v1457_v56 = vpop.permute.xlu2 %1456 }
 0x2e6   :  { %2283 = vmatmul.msk.f32.vlgmr.msra.gmra.mxu0 %vm988_vm11, %v2281_v38  ;;  %2285 = vmatmul.msk.f32.vlgmr.msra.gmra.mxu1 %vm988_vm11, %v2281_v38 }
 0x2ea   :  { %v1275_v40 = vpop.permute.xlu1 %1274 }
 0x2eb   :  { %v1279_v42 = vsel %vm1278_vm15, %v1273_v39, %v1275_v40  ;;  %v1280_v43 = vsel %vm1278_vm15, %v1275_v40, %v1277_v13 }
 0x2ec   :  { %2287 = vmatpush.msk.msra.mxu2 %vm992_vm10, %v1279_v42  ;;  %2289 = vmatpush.msk.msra.mxu3 %vm992_vm10, %v1280_v43  ;;  %v1511_v42 = vld [vmem:[%s2990_s6] sm:$0xff] }
 0x2ed   :  { %2288 = vmatmul.msk.f32.vlgmr.msra.gmra.mxu2 %vm988_vm11, %v2286_v41  ;;  %2290 = vmatmul.msk.f32.vlgmr.msra.gmra.mxu3 %vm988_vm11, %v2286_v41  ;;  %v1510_v41 = vld [vmem:[%s2989_s5] sm:$0xff] }
 0x2f2   :  { %v1335_v46 = vpop.permute.xlu1 %1334 }
 0x2f3   :  { %v1339_v48 = vsel %vm1338_vm0, %v1333_v45, %v1335_v46  ;;  %v1340_v49 = vsel %vm1338_vm0, %v1335_v46, %v1337_v44 }
 0x2f4   :  { %2292 = vmatpush.msk.msrb.mxu0 %vm992_vm10, %v1339_v48  ;;  %2294 = vmatpush.msk.msrb.mxu1 %vm992_vm10, %v1340_v49 }
 0x2f5   :  { %2293 = vmatmul.msk.f32.vlgmr.msrb.gmra.mxu0 %vm988_vm11, %v2291_v47  ;;  %2295 = vmatmul.msk.f32.vlgmr.msrb.gmra.mxu1 %vm988_vm11, %v2291_v47 }
 0x2fa   :  { %v1395_v52 = vpop.permute.xlu1 %1394 }
 0x2fb   :  { %v1399_v54 = vsel %vm1398_vm1, %v1393_v51, %v1395_v52  ;;  %v1400_v55 = vsel %vm1398_vm1, %v1395_v52, %v1397_v50 }
 0x2fc   :  { %2297 = vmatpush.msk.msrb.mxu2 %vm992_vm10, %v1399_v54  ;;  %2299 = vmatpush.msk.msrb.mxu3 %vm992_vm10, %v1400_v55 }
 0x2fd   :  { %2298 = vmatmul.msk.f32.vlgmr.msrb.gmra.mxu2 %vm988_vm11, %v2296_v53  ;;  %2300 = vmatmul.msk.f32.vlgmr.msrb.gmra.mxu3 %vm988_vm11, %v2296_v53 }
 0x302   :  { %v1455_v58 = vpop.permute.xlu1 %1454 }
 0x303   :  { %v1459_v60 = vsel %vm1458_vm2, %v1453_v57, %v1455_v58  ;;  %v1460_v61 = vsel %vm1458_vm2, %v1455_v58, %v1457_v56 }
 0x304   :  { %2302 = vmatpush.msk.msra.mxu0 %vm992_vm10, %v1459_v60  ;;  %2304 = vmatpush.msk.msra.mxu1 %vm992_vm10, %v1460_v61 }
 0x305   :  { %2303 = vmatmul.msk.f32.vlgmr.msra.gmra.mxu0 %vm988_vm11, %v2301_v59  ;;  %2305 = vmatmul.msk.f32.vlgmr.msra.gmra.mxu1 %vm988_vm11, %v2301_v59 }
 0x34a   :  { %v1014_v62 = vpop.f32.mrf.mxu0  ;;  %v1034_v63 = vpop.f32.mrf.mxu1 }
 0x358   :  { %v1070_v1 = vpop.f32.mrf.mxu2  ;;  %v1090_v3 = vpop.f32.mrf.mxu3 }
 0x359   :  { %v1091_v7 = vadd.f32 %v1090_v3, %v1034_v63  ;;  %v1071_v8 = vadd.f32 %v1070_v1, %v1014_v62 }
 0x35a   :  { %v1128_v5 = vpop.f32.mrf.mxu0  ;;  %v1148_v6 = vpop.f32.mrf.mxu1 }
 0x35b   :  { %v1152_v9 = vadd.f32 %v1148_v6, %v1091_v7  ;;  %v1151_v12 = vadd.f32 %v1128_v5, %v1071_v8 }
 0x363   :  { %v1239_v10 = vpop.f32.mrf.mxu0  ;;  %v1259_v11 = vpop.f32.mrf.mxu1 }
 0x368   :  { %v1188_v2 = vpop.f32.mrf.mxu2  ;;  %v1208_v4 = vpop.f32.mrf.mxu3 }
 0x369   :  { %v1212_v13 = vadd.f32 %v1208_v4, %v1152_v9  ;;  %v1211_v14 = vadd.f32 %v1188_v2, %v1151_v12 }
 0x36b   :  { %v1263_v16 = vadd.f32 %v1259_v11, %v1212_v13  ;;  %v1262_v19 = vadd.f32 %v1239_v10, %v1211_v14 }
 0x370   :  { %v1305_v17 = vpop.f32.mrf.mxu2  ;;  %v1325_v18 = vpop.f32.mrf.mxu3 }
 0x371   :  { %v1328_v22 = vadd.f32 %v1305_v17, %v1262_v19  ;;  %v1329_v23 = vadd.f32 %v1325_v18, %v1263_v16 }
 0x372   :  { %v1365_v20 = vpop.f32.mrf.mxu0  ;;  %v1385_v21 = vpop.f32.mrf.mxu1 }
 0x373   :  { %v1388_v26 = vadd.f32 %v1365_v20, %v1328_v22  ;;  %v1389_v27 = vadd.f32 %v1385_v21, %v1329_v23 }
 0x380   :  { %v1425_v28 = vpop.f32.mrf.mxu2  ;;  %v1445_v29 = vpop.f32.mrf.mxu3 }
 0x381   :  { %v1448_v30 = vadd.f32 %v1425_v28, %v1388_v26  ;;  %v1449_v31 = vadd.f32 %v1445_v29, %v1389_v27 }
 0x382   :  { %v1485_v32 = vpop.f32.mrf.mxu0  ;;  %v1505_v33 = vpop.f32.mrf.mxu1 }
 0x383   :  { %v2845_v35 = vadd.f32 %v1485_v32, %v1448_v30  ;;  %v2847_v36 = vadd.f32 %v1505_v33, %v1449_v31 }
 0x385   :  { %v1566_v37 = vsel %vm2841_vm4, %v2847_v36, 0.0  ;;  %v1515_v38 = vsel %vm2841_vm4, %v2845_v35, 0.0 }
 0x386   :  { %1567 = vadd.xlane.f32.xlu1 %v1566_v37  ;;  %1516 = vadd.xlane.f32.xlu0 %v1515_v38  ;;  %v1518_v39 = vmul.f32 %v1515_v38, %v1515_v38  ;;  %v1569_v40 = vmul.f32 %v1566_v37, %v1566_v37 }
 0x388   :  { %1519 = vadd.xlane.f32.xlu2 %v1518_v39 }
 0x390   :  { %1570 = vadd.xlane.f32.xlu2 %v1569_v40 }
 0x39a   :  { %1553 = vperm.xlu0 %2359, %v1510_v41  }
 0x39f   :  { %1559 = vperm.xlu1 %2360, %v1511_v42  }
 0x3f9   :  { %v1517_v43 = vpop.xlane.xlu0 %1516  ;;  %v1568_v45 = vpop.xlane.xlu1 %1567 }
 0x3fa   :  { %v1521_v44 = vmul.f32 0.015625, %v1517_v43  ;;  %v2861_v48 = vmul.f32 0.015625, %v1568_v45 }
 0x3fb   :  { %v1520_v46 = vpop.xlane.xlu2 %1519 }
 0x3fc   :  { %v1522_v47 = vmul.f32 %v1521_v44, %v1517_v43  ;;  %v1573_v51 = vmul.f32 %v2861_v48, %v1568_v45  ;;  %v1549_v24 = vsub.f32 %v2845_v35, %v1521_v44  ;;  %v1600_v33 = vsub.f32 %v2847_v36, %v2861_v48  ;;  %v1607_v35 = vld [vmem:[#allocation2] sm:$0xff] }
 0x3fe   :  { %v1523_v49 = vsub.f32 %v1520_v46, %v1522_v47  ;;  %v1886_v47 = vld [vmem:[#allocation2 + $0x18] sm:$0xff] }
 0x400   :  { %v1524_v50 = vmul.f32 0.015873017, %v1523_v49 }
 0x402   :  { %v1525_v52 = vmax.f32 %v1524_v50, 0.0 }
 0x403   :  { %v1571_v53 = vpop.xlane.xlu2 %1570 }
 0x404   :  { %2401 = vrsqrt.f32 %v1525_v52  ;;  %v1574_v54 = vsub.f32 %v1571_v53, %v1573_v51  ;;  %vm1533_vm5 = vcmp.eq.f32.partialorder %v1525_v52, inf  ;;  %v1536_v6 = vand.u32 2147483648, %v1525_v52  ;;  %v2306_v51 = vld [vmem:[%s2991_s7 + $0x8] sm:$0xff] }
 0x405   :  { %vm1535_vm6 = vcmp.eq.f32.partialorder %v1525_v52, 0.0 }
 0x406   :  { %v1575_v55 = vmul.f32 0.015873017, %v1574_v54 }
 0x408   :  { %v1576_v56 = vmax.f32 %v1575_v55, 0.0 }
 0x40a   :  { %v2402_v57 = vpop.eup %2401  ;;  %2403 = vrsqrt.f32 %v1576_v56  ;;  %vm1584_vm7 = vcmp.eq.f32.partialorder %v1576_v56, inf  ;;  %v1587_v11 = vand.u32 2147483648, %v1576_v56  ;;  %vm1586_vm8 = vcmp.eq.f32.partialorder %v1576_v56, 0.0 }
 0x40b   :  { %v1527_v58 = vmul.f32 %v2402_v57, %v1525_v52 }
 0x40c   :  { %v1554_v25 = vpop.permute.xlu0 %1553 }
 0x40d   :  { %v1528_v59 = vmul.f32 %v2402_v57, %v1527_v58 }
 0x40f   :  { %v1529_v60 = vmul.f32 0.5, %v1528_v59 }
 0x410   :  { %v2404_v61 = vpop.eup %2403 }
 0x411   :  { %v1578_v62 = vmul.f32 %v2404_v61, %v1576_v56  ;;  %v1530_v63 = vsub.f32 1.5, %v1529_v60  ;;  %v1560_v30 = vpop.permute.xlu1 %1559 }
 0x413   :  { %v1531_v0 = vmul.f32 %v2402_v57, %v1530_v63  ;;  %v1579_v1 = vmul.f32 %v2404_v61, %v1578_v62  ;;  %v2311_v57 = vld [vmem:[%s2991_s7 + $0x10] sm:$0xff]  ;;  %v2317_v63 = vld [vmem:[%s2991_s7 + $0x20] sm:$0xff] }
 0x415   :  { %v1532_v3 = vmul.f32 %v1531_v0, %v1525_v52  ;;  %v1580_v5 = vmul.f32 0.5, %v1579_v1 }
 0x417   :  { %v1534_v7 = vsel %vm1533_vm5, %v1525_v52, %v1532_v3  ;;  %v1581_v2 = vsub.f32 1.5, %v1580_v5 }
 0x418   :  { %v1537_v4 = vsel %vm1535_vm6, %v1536_v6, %v1534_v7 }
 0x419   :  { %v1538_v8 = vadd.f32 0.001, %v1537_v4  ;;  %v1582_v9 = vmul.f32 %v2404_v61, %v1581_v2  ;;  %v1610_v61 = vld [vmem:[%s2991_s7] sm:$0xff] }
 0x41b   :  { %2405 = vrsqrt.f32 %v1538_v8  ;;  %v1583_v10 = vmul.f32 %v1582_v9, %v1576_v56  ;;  %vm1545_vm11 = vweird.f32 %v1538_v8 }
 0x41d   :  { %v1585_v12 = vsel %vm1584_vm7, %v1576_v56, %v1583_v10  ;;  %v2323_v10 = vld [vmem:[%s2991_s7 + $0x30] sm:$0xff] }
 0x41e   :  { %v1588_v13 = vsel %vm1586_vm8, %v1587_v11, %v1585_v12  ;;  %vm1626_vm8 = vcmask 64512  }
 0x41f   :  { %v1589_v14 = vadd.f32 0.001, %v1588_v13 }
 0x421   :  { %v2406_v15 = vpop.eup %2405  ;;  %2407 = vrsqrt.f32 %v1589_v14  ;;  %vm1596_vm6 = vweird.f32 %v1589_v14 }
 0x422   :  { %v1540_v16 = vmul.f32 %v2406_v15, %v1538_v8  ;;  %vm1546_vm10 = vweird.f32 %v2406_v15 }
 0x423   :  { %vm1547_vm3 = vmor %vm1545_vm11, %vm1546_vm10 }
 0x424   :  { %v1541_v17 = vmul.f32 %v2406_v15, %v1540_v16 }
 0x426   :  { %v1542_v18 = vmul.f32 0.5, %v1541_v17 }
 0x427   :  { %v2408_v19 = vpop.eup %2407 }
 0x428   :  { %v1543_v20 = vsub.f32 1.5, %v1542_v18  ;;  %v1591_v21 = vmul.f32 %v2408_v19, %v1589_v14  ;;  %vm1597_vm5 = vweird.f32 %v2408_v19 }
 0x429   :  { %vm1598_vm7 = vmor %vm1596_vm6, %vm1597_vm5 }
 0x42a   :  { %v1544_v22 = vmul.f32 %v2406_v15, %v1543_v20  ;;  %v1592_v23 = vmul.f32 %v2408_v19, %v1591_v21 }
 0x42c   :  { %v1548_v26 = vsel %vm1547_vm3, %v2406_v15, %v1544_v22  ;;  %v1593_v27 = vmul.f32 0.5, %v1592_v23 }
 0x42d   :  { %v1550_v28 = vmul.f32 %v1549_v24, %v1548_v26 }
 0x42e   :  { %v1594_v29 = vsub.f32 1.5, %v1593_v27 }
 0x42f   :  { %v1556_v31 = vmul.f32 %v1554_v25, %v1550_v28 }
 0x430   :  { %v1595_v32 = vmul.f32 %v2408_v19, %v1594_v29  ;;  %v2320_v29 = vld [vmem:[%s2991_s7 + $0x28] sm:$0xff] }
 0x431   :  { %v1562_v37 = vadd.f32 %v1560_v30, %v1556_v31 }
 0x432   :  { %v1599_v38 = vsel %vm1598_vm7, %v2408_v19, %v1595_v32  ;;  %v2314_v19 = vld [vmem:[%s2991_s7 + $0x18] sm:$0xff] }
 0x433   :  { %v1601_v39 = vmul.f32 %v1600_v33, %v1599_v38  ;;  %v1563_v40 = vmax.f32 %v1562_v37, 0.0  ;;  %v2326_v38 = vld [vmem:[%s2991_s7 + $0x38] sm:$0xff] }
 0x435   :  { %v1602_v41 = vmul.f32 %v1601_v39, %v1554_v25  ;;  %v1564_v42 = vsel %vm2841_vm4, %v1563_v40, 0.0  ;;  %v2329_v39 = vld [vmem:[%s2991_s7 + $0x40] sm:$0xff] }
 0x436   :  { %1565 = vst [vmem:[#allocation2 + $0x8] sm:$0xff] %v1564_v42  ;;  %v2361_v43 = vpack.i.bf16 %v1564_v42, %v1607_v35 }
 0x437   :  { %v2869_v44 = vadd.f32 %v1602_v41, %v1560_v30 }
 0x438   :  { %2362 = vrot.lane.b32.xlu2 %v2361_v43, %s2461_s17 }
 0x439   :  { %v1604_v45 = vmax.f32 %v2869_v44, 0.0 }
 0x43b   :  { %v1605_v36 = vsel %vm2841_vm4, %v1604_v45, 0.0 }
 0x43c   :  { %1606 = vst [vmem:[#allocation2 + $0x10] sm:$0xff] %v1605_v36  ;;  %1674 = vrot.lane.b32.xlu0 %v1605_v36, %s2452_s29  ;;  %1620 = vrot.lane.b32.xlu1 %v1605_v36, %s2461_s17  ;;  %v2381_v46 = vpack.i.bf16 %v1605_v36, %v1564_v42 }
 0x440   :  { %2367 = vrot.lane.b32.xlu2 %v2361_v43, %s2462_s18 }
 0x444   :  { %2382 = vrot.lane.b32.xlu0 %v2381_v46, %s2465_s21  ;;  %1729 = vrot.lane.b32.xlu1 %v1605_v36, %s2462_s18 }
 0x448   :  { %2372 = vrot.lane.b32.xlu2 %v2361_v43, %s2452_s29 }
 0x44c   :  { %1896 = vrot.lane.b32.xlu0 %v1886_v47, %s2464_s20  ;;  %2377 = vrot.lane.b32.xlu1 %v2361_v43, %s2463_s19 }
 0x450   :  { %1786 = vrot.lane.b32.xlu2 %v1605_v36, %s2463_s19 }
 0x454   :  { %2397 = vrot.lane.b32.xlu0 %v2381_v46, %s2466_s22  ;;  %1953 = vrot.lane.b32.xlu1 %v1886_v47, %s2465_s21 }
 0x458   :  { %2387 = vrot.lane.b32.xlu2 %v2381_v46, %s2464_s20 }
 0x45c   :  { %2392 = vrot.lane.b32.xlu1 %v2381_v46, %s2467_s0 }
 0x460   :  { %2067 = vrot.lane.b32.xlu2 %v1886_v47, %s2467_s0 }
 0x464   :  { %2010 = vrot.lane.b32.xlu1 %v1886_v47, %s2466_s22 }
 0x492   :  { %v2363_v48 = vpop.permute.xlu2 %2362 }
 0x493   :  { %v2365_v49 = vunpack.i.h.bf16 %v2363_v48  ;;  %v2364_v50 = vunpack.i.l.bf16 %v2363_v48 }
 0x495   :  { %v1622_v52 = vsel %vm985_vm9, %v2364_v50, %v2365_v49 }
 0x496   :  { %1645 = vmatpush.msra.mxu2 %v1622_v52 }
 0x497   :  { %2307 = vmatmul.msk.f32.vlgmr.msra.gmra.mxu2 %vm1626_vm8, %v2306_v51 }
 0x49a   :  { %v2368_v53 = vpop.permute.xlu2 %2367 }
 0x49b   :  { %v2370_v54 = vunpack.i.h.bf16 %v2368_v53  ;;  %v2369_v55 = vunpack.i.l.bf16 %v2368_v53 }
 0x49d   :  { %v1731_v56 = vsel %vm1101_vm13, %v2369_v55, %v2370_v54 }
 0x49e   :  { %1753 = vmatpush.msrb.mxu2 %v1731_v56 }
 0x49f   :  { %2312 = vmatmul.msk.f32.vlgmr.msrb.gmra.mxu2 %vm1626_vm8, %v2311_v57 }
 0x4a0   :  { %2417 = vmatpush.msk.msra.mxu2 %vm2841_vm4, %v1563_v40 }
 0x4a2   :  { %v2373_v58 = vpop.permute.xlu2 %2372 }
 0x4a3   :  { %v2375_v59 = vunpack.i.h.bf16 %v2373_v58  ;;  %v2374_v60 = vunpack.i.l.bf16 %v2373_v58 }
 0x4a5   :  { %v1676_v62 = vsel %vm1043_vm12, %v2374_v60, %v2375_v59 }
 0x4a6   :  { %1698 = vmatpush.msrb.mxu0 %v1676_v62 }
 0x4a7   :  { %2309 = vmatmul.msk.f32.vlgmr.msrb.gmra.mxu0 %vm1626_vm8, %v1610_v61  ;;  %2318 = vmatmul.msk.f32.vlgmr.msra.gmra.mxu2 %vm1626_vm8, %v2317_v63 }
 0x4aa   :  { %v1787_v6 = vpop.permute.xlu2 %1786 }
 0x4ae   :  { %v1675_v0 = vpop.permute.xlu0 %1674  ;;  %v1621_v1 = vpop.permute.xlu1 %1620 }
 0x4af   :  { %v1677_v3 = vsel %vm1043_vm12, %v2375_v59, %v1675_v0  ;;  %v1623_v5 = vsel %vm985_vm9, %v2365_v49, %v1621_v1 }
 0x4b0   :  { %1665 = vmatpush.msra.mxu3 %v1623_v5  ;;  %1718 = vmatpush.msrb.mxu1 %v1677_v3 }
 0x4b1   :  { %2308 = vmatmul.msk.f32.vlgmr.msra.gmra.mxu3 %vm1626_vm8, %v2306_v51  ;;  %2310 = vmatmul.msk.f32.vlgmr.msrb.gmra.mxu1 %vm1626_vm8, %v1610_v61 }
 0x4b2   :  { %v2388_v12 = vpop.permute.xlu2 %2387 }
 0x4b3   :  { %v2390_v15 = vunpack.i.h.bf16 %v2388_v12  ;;  %v2389_v16 = vunpack.i.l.bf16 %v2388_v12 }
 0x4b5   :  { %v1898_v23 = vsel %vm1278_vm15, %v2389_v16, %v2390_v15  ;;  %v2118_v16 = vld [vmem:[%s2992_s8] sm:$0xff]  ;;  %s2469_s8 = smov [#allocation3]  }
 0x4b6   :  { %v2383_v7 = vpop.permute.xlu0 %2382  ;;  %v1730_v2 = vpop.permute.xlu1 %1729 }
 0x4b7   :  { %v2385_v4 = vunpack.i.h.bf16 %v2383_v7  ;;  %v2384_v8 = vunpack.i.l.bf16 %v2383_v7  ;;  %v1732_v9 = vsel %vm1101_vm13, %v2370_v54, %v1730_v2 }
 0x4b8   :  { %1773 = vmatpush.msrb.mxu3 %v1732_v9 }
 0x4b9   :  { %2313 = vmatmul.msk.f32.vlgmr.msrb.gmra.mxu3 %vm1626_vm8, %v2311_v57  ;;  %v1955_v11 = vsel %vm1338_vm0, %v2384_v8, %v2385_v4 }
 0x4ba   :  { %2418 = vmatpush.msk.msra.mxu3 %vm2841_vm4, %v1604_v45  ;;  %1977 = vmatpush.msrb.mxu2 %v1955_v11  ;;  %v2068_v32 = vpop.permute.xlu2 %2067 }
 0x4bb   :  { %2324 = vmatmul.msk.f32.vlgmr.msrb.gmra.mxu2 %vm1626_vm8, %v2323_v10 }
 0x4be   :  { %v1897_v13 = vpop.permute.xlu0 %1896  ;;  %v2378_v14 = vpop.permute.xlu1 %2377 }
 0x4bf   :  { %v2380_v17 = vunpack.i.h.bf16 %v2378_v14  ;;  %v2379_v18 = vunpack.i.l.bf16 %v2378_v14  ;;  %v1899_v22 = vsel %vm1278_vm15, %v2390_v15, %v1897_v13 }
 0x4c1   :  { %2319 = vmatmul.msk.f32.vlgmr.msra.gmra.mxu3 %vm1626_vm8, %v2317_v63  ;;  %v1788_v20 = vsel %vm1161_vm14, %v2379_v18, %v2380_v17  ;;  %v1789_v21 = vsel %vm1161_vm14, %v2380_v17, %v1787_v6  ;;  %v2119_v17 = vld [vmem:[%s2993_s9] sm:$0xff]  ;;  %s2215_s9 = sshll.u32 %s2469_s8, 4  ;;  %s2216_s9 = int_to_ptr.vmem [resolvable:$true] %s2215_s9 }
 0x4c2   :  { %1810 = vmatpush.msra.mxu0 %v1788_v20  ;;  %1830 = vmatpush.msra.mxu1 %v1789_v21 }
 0x4c3   :  { %2315 = vmatmul.msk.f32.vlgmr.msra.gmra.mxu0 %vm1626_vm8, %v2314_v19  ;;  %2316 = vmatmul.msk.f32.vlgmr.msra.gmra.mxu1 %vm1626_vm8, %v2314_v19 }
 0x4c4   :  { %1940 = vmatpush.msrb.mxu1 %v1899_v22  ;;  %1920 = vmatpush.msrb.mxu0 %v1898_v23 }
 0x4c6   :  { %v2398_v24 = vpop.permute.xlu0 %2397  ;;  %v1954_v25 = vpop.permute.xlu1 %1953 }
 0x4c7   :  { %v2400_v26 = vunpack.i.h.bf16 %v2398_v24  ;;  %v2399_v27 = vunpack.i.l.bf16 %v2398_v24  ;;  %v1956_v28 = vsel %vm1338_vm0, %v2385_v4, %v1954_v25 }
 0x4c8   :  { %1997 = vmatpush.msrb.mxu3 %v1956_v28 }
 0x4c9   :  { %2325 = vmatmul.msk.f32.vlgmr.msrb.gmra.mxu3 %vm1626_vm8, %v2323_v10  ;;  %v2012_v30 = vsel %vm1398_vm1, %v2399_v27, %v2400_v26 }
 0x4ca   :  { %2034 = vmatpush.msra.mxu0 %v2012_v30 }
 0x4cb   :  { %2321 = vmatmul.msk.f32.vlgmr.msrb.gmra.mxu0 %vm1626_vm8, %v2320_v29  ;;  %2322 = vmatmul.msk.f32.vlgmr.msrb.gmra.mxu1 %vm1626_vm8, %v2320_v29 }
 0x4ce   :  { %v2393_v31 = vpop.permute.xlu1 %2392 }
 0x4cf   :  { %v2395_v33 = vunpack.i.h.bf16 %v2393_v31  ;;  %v2394_v37 = vunpack.i.l.bf16 %v2393_v31 }
 0x4d1   :  { %v2070_v40 = vsel %vm1458_vm2, %v2395_v33, %v2068_v32  ;;  %v2069_v35 = vsel %vm1458_vm2, %v2394_v37, %v2395_v33 }
 0x4d2   :  { %2091 = vmatpush.msra.mxu2 %v2069_v35  ;;  %2111 = vmatpush.msra.mxu3 %v2070_v40 }
 0x4d3   :  { %2327 = vmatmul.msk.f32.vlgmr.msra.gmra.mxu0 %vm1626_vm8, %v2326_v38  ;;  %2330 = vmatmul.msk.f32.vlgmr.msra.gmra.mxu2 %vm1626_vm8, %v2329_v39 }
 0x4d4   :  { %2331 = vmatmul.msk.f32.vlgmr.msra.gmra.mxu3 %vm1626_vm8, %v2329_v39 }
 0x4d6   :  { %v2011_v41 = vpop.permute.xlu1 %2010 }
 0x4d7   :  { %v2013_v42 = vsel %vm1398_vm1, %v2400_v26, %v2011_v41 }
 0x4d8   :  { %2054 = vmatpush.msra.mxu1 %v2013_v42 }
 0x4d9   :  { %2328 = vmatmul.msk.f32.vlgmr.msra.gmra.mxu1 %vm1626_vm8, %v2326_v38 }
 0x51a   :  { %v1647_v43 = vpop.f32.mrf.mxu2 }
 0x522   :  { %v1755_v46 = vpop.f32.mrf.mxu2 }
 0x524   :  { %v1700_v45 = vpop.f32.mrf.mxu0 }
 0x525   :  { %v1701_v49 = vadd.f32 %v1700_v45, %v1647_v43 }
 0x527   :  { %v1778_v53 = vadd.f32 %v1755_v46, %v1701_v49 }
 0x52a   :  { %v1859_v51 = vpop.f32.mrf.mxu2 }
 0x52e   :  { %v1720_v36 = vpop.f32.mrf.mxu1 }
 0x534   :  { %v1667_v44 = vpop.f32.mrf.mxu3 }
 0x535   :  { %v1721_v55 = vadd.f32 %v1720_v36, %v1667_v44 }
 0x53c   :  { %v1775_v47 = vpop.f32.mrf.mxu3 }
 0x53d   :  { %v1779_v57 = vadd.f32 %v1775_v47, %v1721_v55 }
 0x53e   :  { %v1979_v60 = vpop.f32.mrf.mxu2 }
 0x540   :  { %v1812_v48 = vpop.f32.mrf.mxu0  ;;  %v1832_v50 = vpop.f32.mrf.mxu1 }
 0x541   :  { %v1835_v56 = vadd.f32 %v1812_v48, %v1778_v53  ;;  %v1836_v61 = vadd.f32 %v1832_v50, %v1779_v57 }
 0x543   :  { %v1882_v58 = vadd.f32 %v1859_v51, %v1835_v56 }
 0x544   :  { %v1879_v52 = vpop.f32.mrf.mxu3 }
 0x545   :  { %v1883_v0 = vadd.f32 %v1879_v52, %v1836_v61 }
 0x548   :  { %v1922_v54 = vpop.f32.mrf.mxu0  ;;  %v1942_v59 = vpop.f32.mrf.mxu1 }
 0x549   :  { %v1945_v62 = vadd.f32 %v1922_v54, %v1882_v58  ;;  %v1946_v3 = vadd.f32 %v1942_v59, %v1883_v0 }
 0x54b   :  { %v2002_v5 = vadd.f32 %v1979_v60, %v1945_v62 }
 0x54c   :  { %v1999_v63 = vpop.f32.mrf.mxu3 }
 0x54d   :  { %v2003_v6 = vadd.f32 %v1999_v63, %v1946_v3 }
 0x550   :  { %v2036_v1 = vpop.f32.mrf.mxu0 }
 0x551   :  { %v2059_v7 = vadd.f32 %v2036_v1, %v2002_v5 }
 0x556   :  { %v2056_v2 = vpop.f32.mrf.mxu1  ;;  %v2093_v4 = vpop.f32.mrf.mxu2 }
 0x557   :  { %v2060_v8 = vadd.f32 %v2056_v2, %v2003_v6  ;;  %v2959_v9 = vadd.f32 %v2093_v4, %v2059_v7  ;;  %v2113_v10 = vpop.f32.mrf.mxu3 }
 0x559   :  { %v2961_v11 = vadd.f32 %v2113_v10, %v2060_v8  ;;  %v2120_v12 = vsel %vm2841_vm4, %v2959_v9, 0.0 }
 0x55a   :  { %2121 = vadd.xlane.f32.xlu2 %v2120_v12  ;;  %v2123_v13 = vmul.f32 %v2120_v12, %v2120_v12 }
 0x55b   :  { %v2170_v14 = vsel %vm2841_vm4, %v2961_v11, 0.0 }
 0x55c   :  { %2171 = vadd.xlane.f32.xlu0 %v2170_v14  ;;  %2124 = vadd.xlane.f32.xlu1 %v2123_v13  ;;  %v2173_v15 = vmul.f32 %v2170_v14, %v2170_v14 }
 0x562   :  { %2174 = vadd.xlane.f32.xlu2 %v2173_v15 }
 0x570   :  { %2158 = vperm.xlu0 %2359, %v2118_v16  }
 0x575   :  { %2164 = vperm.xlu1 %2360, %v2119_v17  }
 0x5cd   :  { %v2122_v18 = vpop.xlane.xlu2 %2121 }
 0x5ce   :  { %v2126_v19 = vmul.f32 0.015625, %v2122_v18 }
 0x5cf   :  { %v2172_v20 = vpop.xlane.xlu0 %2171  ;;  %v2125_v22 = vpop.xlane.xlu1 %2124 }
 0x5d0   :  { %v2127_v21 = vmul.f32 %v2126_v19, %v2122_v18  ;;  %v2975_v34 = vmul.f32 0.015625, %v2172_v20  ;;  %v2154_v0 = vsub.f32 %v2959_v9, %v2126_v19 }
 0x5d2   :  { %v2128_v23 = vsub.f32 %v2125_v22, %v2127_v21  ;;  %v2177_v24 = vmul.f32 %v2975_v34, %v2172_v20  ;;  %v2204_v2 = vsub.f32 %v2961_v11, %v2975_v34 }
 0x5d4   :  { %v2129_v25 = vmul.f32 0.015873017, %v2128_v23 }
 0x5d5   :  { %v2175_v26 = vpop.xlane.xlu2 %2174 }
 0x5d6   :  { %v2130_v27 = vmax.f32 %v2129_v25, 0.0  ;;  %v2178_v28 = vsub.f32 %v2175_v26, %v2177_v24 }
 0x5d8   :  { %2409 = vrsqrt.f32 %v2130_v27  ;;  %v2179_v29 = vmul.f32 0.015873017, %v2178_v28  ;;  %vm2138_vm9 = vcmp.eq.f32.partialorder %v2130_v27, inf  ;;  %v2141_v45 = vand.u32 2147483648, %v2130_v27 }
 0x5d9   :  { %vm2140_vm12 = vcmp.eq.f32.partialorder %v2130_v27, 0.0 }
 0x5da   :  { %v2180_v30 = vmax.f32 %v2179_v29, 0.0 }
 0x5dc   :  { %2411 = vrsqrt.f32 %v2180_v30  ;;  %vm2188_vm13 = vcmp.eq.f32.partialorder %v2180_v30, inf  ;;  %v2191_v50 = vand.u32 2147483648, %v2180_v30  ;;  %vm2190_vm14 = vcmp.eq.f32.partialorder %v2180_v30, 0.0 }
 0x5de   :  { %v2410_v31 = vpop.eup %2409 }
 0x5df   :  { %v2132_v32 = vmul.f32 %v2410_v31, %v2130_v27 }
 0x5e1   :  { %v2133_v33 = vmul.f32 %v2410_v31, %v2132_v32 }
 0x5e2   :  { %v2412_v37 = vpop.eup %2411  ;;  %v2159_v6 = vpop.permute.xlu0 %2158 }
 0x5e3   :  { %v2134_v38 = vmul.f32 0.5, %v2133_v33  ;;  %v2182_v39 = vmul.f32 %v2412_v37, %v2180_v30 }
 0x5e5   :  { %v2135_v40 = vsub.f32 1.5, %v2134_v38  ;;  %v2183_v35 = vmul.f32 %v2412_v37, %v2182_v39 }
 0x5e7   :  { %v2136_v41 = vmul.f32 %v2410_v31, %v2135_v40  ;;  %v2184_v42 = vmul.f32 0.5, %v2183_v35  ;;  %v2165_v10 = vpop.permute.xlu1 %2164 }
 0x5e9   :  { %v2137_v43 = vmul.f32 %v2136_v41, %v2130_v27  ;;  %v2185_v44 = vsub.f32 1.5, %v2184_v42 }
 0x5eb   :  { %v2139_v36 = vsel %vm2138_vm9, %v2130_v27, %v2137_v43  ;;  %v2186_v46 = vmul.f32 %v2412_v37, %v2185_v44 }
 0x5ec   :  { %v2142_v47 = vsel %vm2140_vm12, %v2141_v45, %v2139_v36 }
 0x5ed   :  { %v2143_v48 = vadd.f32 0.001, %v2142_v47  ;;  %v2187_v49 = vmul.f32 %v2186_v46, %v2180_v30 }
 0x5ef   :  { %2413 = vrsqrt.f32 %v2143_v48  ;;  %v2189_v51 = vsel %vm2188_vm13, %v2180_v30, %v2187_v49  ;;  %vm2150_vm0 = vweird.f32 %v2143_v48 }
 0x5f0   :  { %v2192_v52 = vsel %vm2190_vm14, %v2191_v50, %v2189_v51 }
 0x5f1   :  { %v2193_v53 = vadd.f32 0.001, %v2192_v52 }
 0x5f3   :  { %2415 = vrsqrt.f32 %v2193_v53  ;;  %vm2200_vm4 = vweird.f32 %v2193_v53 }
 0x5f5   :  { %v2414_v54 = vpop.eup %2413 }
 0x5f6   :  { %v2145_v55 = vmul.f32 %v2414_v54, %v2143_v48  ;;  %vm2151_vm15 = vweird.f32 %v2414_v54 }
 0x5f7   :  { %vm2152_vm1 = vmor %vm2150_vm0, %vm2151_vm15 }
 0x5f8   :  { %v2146_v56 = vmul.f32 %v2414_v54, %v2145_v55 }
 0x5f9   :  { %v2416_v57 = vpop.eup %2415 }
 0x5fa   :  { %v2147_v58 = vmul.f32 0.5, %v2146_v56  ;;  %v2195_v59 = vmul.f32 %v2416_v57, %v2193_v53  ;;  %vm2201_vm2 = vweird.f32 %v2416_v57 }
 0x5fb   :  { %vm2202_vm10 = vmor %vm2200_vm4, %vm2201_vm2 }
 0x5fc   :  { %v2148_v60 = vsub.f32 1.5, %v2147_v58  ;;  %v2196_v61 = vmul.f32 %v2416_v57, %v2195_v59 }
 0x5fe   :  { %v2149_v62 = vmul.f32 %v2414_v54, %v2148_v60  ;;  %v2197_v63 = vmul.f32 0.5, %v2196_v61 }
 0x600   :  { %v2153_v1 = vsel %vm2152_vm1, %v2414_v54, %v2149_v62  ;;  %v2198_v3 = vsub.f32 1.5, %v2197_v63 }
 0x601   :  { %v2155_v5 = vmul.f32 %v2154_v0, %v2153_v1 }
 0x602   :  { %v2199_v7 = vmul.f32 %v2416_v57, %v2198_v3 }
 0x603   :  { %v2161_v4 = vmul.f32 %v2159_v6, %v2155_v5 }
 0x604   :  { %v2203_v8 = vsel %vm2202_vm10, %v2416_v57, %v2199_v7 }
 0x605   :  { %v2205_v12 = vmul.f32 %v2204_v2, %v2203_v8  ;;  %v2167_v13 = vadd.f32 %v2165_v10, %v2161_v4 }
 0x607   :  { %v2206_v14 = vmul.f32 %v2205_v12, %v2159_v6  ;;  %v2168_v15 = vmax.f32 %v2167_v13, 0.0 }
 0x609   :  { %2169 = vst [vmem:[#allocation3] sm:$0xff] %v2168_v15  ;;  %v2207_v9 = vadd.f32 %v2206_v14, %v2165_v10 }
 0x60b   :  { %v2208_v16 = vmax.f32 %v2207_v9, 0.0 }
 0x60d   :  { %2210 = vst [vmem:[#allocation3 + $0x8] sm:$0xff] %v2208_v16 }
 0x60e   :  { %2223 = dma.vmem_to_hbm [thread:$0]  %s2216_s9, 256, %s2218_s1, [#allocation4], %s2470_s3, %s2470_s3, %s2471_s26  }
 0x60f   :  { %2443 = dma.done.wait [#allocation4], 256  }
 0x610   :  { %2444 = vsyncadd [#allocation4], 4294967040 }
 0x611   :  { %2228 = vsyncpa [#allocation4], 1 }

</bundles_post_ra>
